<compile_context>
chip_gen: v6e
topology: v6e:2x2x1
jax: 0.10.0
libtpu: 0.0.40
codegen_flags: <defaults>
</compile_context>

<pallas_src>
import functools

import jax
import jax.numpy as jnp
from jax.experimental import pallas as pl
from jax.experimental.pallas import tpu as pltpu

BN_EPS = 1e-5


# ----------------------------- Pallas kernel ---------------------------------------

def _conv3x3_bn_kernel(x_ref, w_ref, s_ref, b_ref, o_ref, *, H, W, Cin):
    """One (batch-element, Cout-tile) step of Conv3x3(s=1, p=1, no bias) + BN affine.

    x_ref : (H+2, W+2, Cin) f32   zero-padded NHWC image of one batch element
    w_ref : (3, 3, Cin, tn) bf16  conv weights laid out (kh, kw, cin, cout)
    s_ref : (1, tn) f32           folded BatchNorm scale
    b_ref : (1, tn) f32           folded BatchNorm bias
    o_ref : (H*W, tn) f32         output tile (pixels flattened row-major)
    """
    img = x_ref[...]                                  # (H+2, W+2, Cin) f32
    w = w_ref[...]                                    # (3, 3, Cin, tn) bf16

    acc = jnp.zeros(o_ref.shape, jnp.float32)
    # In-VMEM im2col: 9 statically shifted taps, each one (H*W, Cin) x (Cin, tn)
    # MXU matmul accumulated in f32. No HBM patch duplication.
    for dh in range(3):
        for dw in range(3):
            tap = img[dh:dh + H, dw:dw + W, :].reshape(H * W, Cin)
            acc += jnp.dot(tap.astype(jnp.bfloat16), w[dh, dw],
                           preferred_element_type=jnp.float32)

    # Eval-mode BatchNorm affine epilogue (no ReLU).
    o_ref[...] = acc * s_ref[...] + b_ref[...]


# ----------------------------- conv wrapper ----------------------------------------

def conv_block_singlenorelu_forward(x_nchw, params):
    """Conv2d(ch_in, ch_out, 3, s=1, p=1, bias=False) + BatchNorm2d (eval), no ReLU.

    x_nchw: (N, Cin, H, W) float32; params: dict(w=OIHW weight, scale, bias).
    Returns (N, Cout, H, W) float32.
    """
    N, Cin, H, W = x_nchw.shape
    w = params["w"]                                   # (Cout, Cin, 3, 3) OIHW
    Cout = w.shape[0]

    # Single zero-padded NHWC slab; the only activation rewrite in the wrapper.
    x_nhwc = jnp.transpose(x_nchw, (0, 2, 3, 1))
    xpad = jnp.pad(x_nhwc, ((0, 0), (1, 1), (1, 1), (0, 0)))   # (N, H+2, W+2, Cin)

    # OIHW -> (kh, kw, cin, cout); bf16 weights for the MXU.
    wmat = jnp.transpose(w, (2, 3, 1, 0)).astype(jnp.bfloat16)  # (3, 3, Cin, Cout)
    scale = params["scale"].astype(jnp.float32).reshape(1, Cout)
    bias = params["bias"].astype(jnp.float32).reshape(1, Cout)

    # Cout tiling: cover Cout with one lane tile when it fits (activations then
    # stream from HBM exactly once); otherwise use 128-aligned tiles.
    if Cout <= 512:
        tn = Cout
    else:
        assert Cout % 128 == 0, "large Cout must be a multiple of 128"
        tn = 256
    grid = (N, Cout // tn)

    HW = H * W
    flops = 2 * N * HW * 9 * Cin * Cout
    bytes_accessed = (
        N * (H + 2) * (W + 2) * Cin * 4                # padded image (read once per n)
        + grid[0] * grid[1] * 9 * Cin * tn * 2         # weights per grid step (upper bound)
        + grid[0] * grid[1] * 2 * tn * 4               # scale + bias per grid step
        + N * HW * Cout * 4)                           # f32 output

    kernel = functools.partial(_conv3x3_bn_kernel, H=H, W=W, Cin=Cin)

    out = pl.pallas_call(
        kernel,
        out_shape=jax.ShapeDtypeStruct((N, HW, Cout), jnp.float32),
        grid_spec=pltpu.PrefetchScalarGridSpec(
            num_scalar_prefetch=0,
            grid=grid,
            in_specs=[
                pl.BlockSpec((None, H + 2, W + 2, Cin), lambda n, j: (n, 0, 0, 0)),
                pl.BlockSpec((3, 3, Cin, tn), lambda n, j: (0, 0, 0, j)),
                pl.BlockSpec((1, tn), lambda n, j: (0, j)),
                pl.BlockSpec((1, tn), lambda n, j: (0, j)),
            ],
            out_specs=pl.BlockSpec((None, HW, tn), lambda n, j: (n, 0, j)),
        ),
        compiler_params=pltpu.CompilerParams(
            dimension_semantics=("parallel", "parallel"),
            vmem_limit_bytes=32 * 1024 * 1024,
        ),
        cost_estimate=pl.CostEstimate(
            flops=flops, transcendentals=0, bytes_accessed=bytes_accessed),
    )(xpad, wmat, scale, bias)

    out = out.reshape(N, H, W, Cout)
    # NHWC -> NCHW to match the PyTorch module contract.
    # (If this feeds another conv block, keep NHWC / bf16 instead.)
    return jnp.transpose(out, (0, 3, 1, 2))


# ----------------------------- parameters (deterministic) --------------------------

def build_params(key, ch_in, ch_out):
    k_w, k_g, k_b = jax.random.split(key, 3)
    fan_in = ch_in * 9
    w = jax.random.normal(k_w, (ch_out, ch_in, 3, 3), jnp.float32) * jnp.sqrt(2.0 / fan_in)
    gamma = 1.0 + 0.1 * jax.random.normal(k_g, (ch_out,), jnp.float32)
    beta = 0.1 * jax.random.normal(k_b, (ch_out,), jnp.float32)
    run_mean = jnp.zeros((ch_out,), jnp.float32)
    run_var = jnp.ones((ch_out,), jnp.float32)
    # fold inference-mode BatchNorm into a per-channel scale / bias
    scale = gamma / jnp.sqrt(run_var + BN_EPS)
    bias = beta - run_mean * scale
    return dict(w=w, scale=scale, bias=bias)


# ----------------------------- reference (for validation) --------------------------

def _reference_forward(x_nchw, params):
    # Round activations/weights to bf16 (matching the kernel's MXU inputs), conv in f32.
    xb = x_nchw.astype(jnp.bfloat16).astype(jnp.float32)
    wb = params["w"].astype(jnp.bfloat16).astype(jnp.float32)
    y = jax.lax.conv_general_dilated(
        xb, wb, window_strides=(1, 1), padding=((1, 1), (1, 1)),
        dimension_numbers=("NCHW", "OIHW", "NCHW"))
    s = params["scale"].reshape(1, -1, 1, 1)
    b = params["bias"].reshape(1, -1, 1, 1)
    return y * s + b


# ----------------------------- main -------------------------------------------------

if __name__ == "__main__":
    root = jax.random.PRNGKey(0)
    ch_in, ch_out = 4, 64

    params = build_params(jax.random.fold_in(root, 1), ch_in, ch_out)
    x = jax.random.normal(jax.random.fold_in(root, 2), (2, ch_in, 16, 16), jnp.float32)

    fwd = jax.jit(conv_block_singlenorelu_forward)
    out = jax.block_until_ready(fwd(x, params))

    assert out.shape == (2, ch_out, 16, 16), out.shape
    assert out.dtype == jnp.float32
    assert bool(jnp.all(jnp.isfinite(out)))

    ref = jax.block_until_ready(_reference_forward(x, params))
    assert bool(jnp.allclose(out, ref, atol=2e-3, rtol=2e-3)), float(
        jnp.max(jnp.abs(out - ref)))

    print("KERNEL_OK")
</pallas_src>

<mosaic_0001>
module attributes {stable_mosaic.version = 11 : i64} {
  func.func @_conv3x3_bn_kernel(%arg0: i32, %arg1: i32, %arg2: memref<1x18x18x4xf32, #tpu.memory_space<vmem>>, %arg3: memref<3x3x4x64xbf16, #tpu.memory_space<vmem>>, %arg4: memref<1x64xf32, #tpu.memory_space<vmem>>, %arg5: memref<1x64xf32, #tpu.memory_space<vmem>>, %arg6: memref<1x256x64xf32, #tpu.memory_space<vmem>>) attributes {dimension_semantics = [#tpu.dimension_semantics<parallel>, #tpu.dimension_semantics<parallel>], iteration_bounds = array<i64: 2, 1>, scalar_prefetch = 0 : i64, scratch_operands = 0 : i64, tpu.core_type = #tpu.core_type<tc>, window_params = [{transform_indices = @transform_0, window_bounds = array<i64: 1, 18, 18, 4>}, {transform_indices = @transform_1, window_bounds = array<i64: 3, 3, 4, 64>}, {transform_indices = @transform_2, window_bounds = array<i64: 1, 64>}, {transform_indices = @transform_3, window_bounds = array<i64: 1, 64>}, {transform_indices = @transform_4, window_bounds = array<i64: 1, 256, 64>}]} {
    %c0 = arith.constant 0 : index
    %c0_0 = arith.constant 0 : index
    %c0_1 = arith.constant 0 : index
    %c0_2 = arith.constant 0 : index
    %0 = vector.load %arg2[%c0, %c0_0, %c0_1, %c0_2] : memref<1x18x18x4xf32, #tpu.memory_space<vmem>>, vector<1x18x18x4xf32>
    %1 = vector.shape_cast %0 : vector<1x18x18x4xf32> to vector<18x18x4xf32>
    %c0_3 = arith.constant 0 : index
    %c0_4 = arith.constant 0 : index
    %c0_5 = arith.constant 0 : index
    %c0_6 = arith.constant 0 : index
    %2 = vector.load %arg3[%c0_3, %c0_4, %c0_5, %c0_6] : memref<3x3x4x64xbf16, #tpu.memory_space<vmem>>, vector<3x3x4x64xbf16>
    %cst = arith.constant 0.000000e+00 : f32
    %3 = vector.broadcast %cst : f32 to vector<256x64xf32>
    %4 = vector.extract_strided_slice %1 {offsets = [0, 0, 0], sizes = [16, 16, 4], strides = [1, 1, 1]} : vector<18x18x4xf32> to vector<16x16x4xf32>
    %5 = vector.shape_cast %4 : vector<16x16x4xf32> to vector<256x4xf32>
    %6 = arith.truncf %5 : vector<256x4xf32> to vector<256x4xbf16>
    %7 = vector.extract_strided_slice %2 {offsets = [0, 0, 0, 0], sizes = [1, 1, 4, 64], strides = [1, 1, 1, 1]} : vector<3x3x4x64xbf16> to vector<1x1x4x64xbf16>
    %8 = vector.shape_cast %7 : vector<1x1x4x64xbf16> to vector<4x64xbf16>
    %cst_7 = arith.constant dense<0.000000e+00> : vector<256x64xf32>
    %9 = tpu.matmul %6, %8, %cst_7 {dimension_numbers = #tpu.dot_dimension_numbers<[1], [0], [0], [1], [0, 0, 1, 1], [], []>} : vector<256x4xbf16>, vector<4x64xbf16>, vector<256x64xf32> -> vector<256x64xf32>
    %10 = arith.addf %3, %9 : vector<256x64xf32>
    %11 = vector.extract_strided_slice %1 {offsets = [0, 1, 0], sizes = [16, 16, 4], strides = [1, 1, 1]} : vector<18x18x4xf32> to vector<16x16x4xf32>
    %12 = vector.shape_cast %11 : vector<16x16x4xf32> to vector<256x4xf32>
    %13 = arith.truncf %12 : vector<256x4xf32> to vector<256x4xbf16>
    %14 = vector.extract_strided_slice %2 {offsets = [0, 1, 0, 0], sizes = [1, 1, 4, 64], strides = [1, 1, 1, 1]} : vector<3x3x4x64xbf16> to vector<1x1x4x64xbf16>
    %15 = vector.shape_cast %14 : vector<1x1x4x64xbf16> to vector<4x64xbf16>
    %cst_8 = arith.constant dense<0.000000e+00> : vector<256x64xf32>
    %16 = tpu.matmul %13, %15, %cst_8 {dimension_numbers = #tpu.dot_dimension_numbers<[1], [0], [0], [1], [0, 0, 1, 1], [], []>} : vector<256x4xbf16>, vector<4x64xbf16>, vector<256x64xf32> -> vector<256x64xf32>
    %17 = arith.addf %10, %16 : vector<256x64xf32>
    %18 = vector.extract_strided_slice %1 {offsets = [0, 2, 0], sizes = [16, 16, 4], strides = [1, 1, 1]} : vector<18x18x4xf32> to vector<16x16x4xf32>
    %19 = vector.shape_cast %18 : vector<16x16x4xf32> to vector<256x4xf32>
    %20 = arith.truncf %19 : vector<256x4xf32> to vector<256x4xbf16>
    %21 = vector.extract_strided_slice %2 {offsets = [0, 2, 0, 0], sizes = [1, 1, 4, 64], strides = [1, 1, 1, 1]} : vector<3x3x4x64xbf16> to vector<1x1x4x64xbf16>
    %22 = vector.shape_cast %21 : vector<1x1x4x64xbf16> to vector<4x64xbf16>
    %cst_9 = arith.constant dense<0.000000e+00> : vector<256x64xf32>
    %23 = tpu.matmul %20, %22, %cst_9 {dimension_numbers = #tpu.dot_dimension_numbers<[1], [0], [0], [1], [0, 0, 1, 1], [], []>} : vector<256x4xbf16>, vector<4x64xbf16>, vector<256x64xf32> -> vector<256x64xf32>
    %24 = arith.addf %17, %23 : vector<256x64xf32>
    %25 = vector.extract_strided_slice %1 {offsets = [1, 0, 0], sizes = [16, 16, 4], strides = [1, 1, 1]} : vector<18x18x4xf32> to vector<16x16x4xf32>
    %26 = vector.shape_cast %25 : vector<16x16x4xf32> to vector<256x4xf32>
    %27 = arith.truncf %26 : vector<256x4xf32> to vector<256x4xbf16>
    %28 = vector.extract_strided_slice %2 {offsets = [1, 0, 0, 0], sizes = [1, 1, 4, 64], strides = [1, 1, 1, 1]} : vector<3x3x4x64xbf16> to vector<1x1x4x64xbf16>
    %29 = vector.shape_cast %28 : vector<1x1x4x64xbf16> to vector<4x64xbf16>
    %cst_10 = arith.constant dense<0.000000e+00> : vector<256x64xf32>
    %30 = tpu.matmul %27, %29, %cst_10 {dimension_numbers = #tpu.dot_dimension_numbers<[1], [0], [0], [1], [0, 0, 1, 1], [], []>} : vector<256x4xbf16>, vector<4x64xbf16>, vector<256x64xf32> -> vector<256x64xf32>
    %31 = arith.addf %24, %30 : vector<256x64xf32>
    %32 = vector.extract_strided_slice %1 {offsets = [1, 1, 0], sizes = [16, 16, 4], strides = [1, 1, 1]} : vector<18x18x4xf32> to vector<16x16x4xf32>
    %33 = vector.shape_cast %32 : vector<16x16x4xf32> to vector<256x4xf32>
    %34 = arith.truncf %33 : vector<256x4xf32> to vector<256x4xbf16>
    %35 = vector.extract_strided_slice %2 {offsets = [1, 1, 0, 0], sizes = [1, 1, 4, 64], strides = [1, 1, 1, 1]} : vector<3x3x4x64xbf16> to vector<1x1x4x64xbf16>
    %36 = vector.shape_cast %35 : vector<1x1x4x64xbf16> to vector<4x64xbf16>
    %cst_11 = arith.constant dense<0.000000e+00> : vector<256x64xf32>
    %37 = tpu.matmul %34, %36, %cst_11 {dimension_numbers = #tpu.dot_dimension_numbers<[1], [0], [0], [1], [0, 0, 1, 1], [], []>} : vector<256x4xbf16>, vector<4x64xbf16>, vector<256x64xf32> -> vector<256x64xf32>
    %38 = arith.addf %31, %37 : vector<256x64xf32>
    %39 = vector.extract_strided_slice %1 {offsets = [1, 2, 0], sizes = [16, 16, 4], strides = [1, 1, 1]} : vector<18x18x4xf32> to vector<16x16x4xf32>
    %40 = vector.shape_cast %39 : vector<16x16x4xf32> to vector<256x4xf32>
    %41 = arith.truncf %40 : vector<256x4xf32> to vector<256x4xbf16>
    %42 = vector.extract_strided_slice %2 {offsets = [1, 2, 0, 0], sizes = [1, 1, 4, 64], strides = [1, 1, 1, 1]} : vector<3x3x4x64xbf16> to vector<1x1x4x64xbf16>
    %43 = vector.shape_cast %42 : vector<1x1x4x64xbf16> to vector<4x64xbf16>
    %cst_12 = arith.constant dense<0.000000e+00> : vector<256x64xf32>
    %44 = tpu.matmul %41, %43, %cst_12 {dimension_numbers = #tpu.dot_dimension_numbers<[1], [0], [0], [1], [0, 0, 1, 1], [], []>} : vector<256x4xbf16>, vector<4x64xbf16>, vector<256x64xf32> -> vector<256x64xf32>
    %45 = arith.addf %38, %44 : vector<256x64xf32>
    %46 = vector.extract_strided_slice %1 {offsets = [2, 0, 0], sizes = [16, 16, 4], strides = [1, 1, 1]} : vector<18x18x4xf32> to vector<16x16x4xf32>
    %47 = vector.shape_cast %46 : vector<16x16x4xf32> to vector<256x4xf32>
    %48 = arith.truncf %47 : vector<256x4xf32> to vector<256x4xbf16>
    %49 = vector.extract_strided_slice %2 {offsets = [2, 0, 0, 0], sizes = [1, 1, 4, 64], strides = [1, 1, 1, 1]} : vector<3x3x4x64xbf16> to vector<1x1x4x64xbf16>
    %50 = vector.shape_cast %49 : vector<1x1x4x64xbf16> to vector<4x64xbf16>
    %cst_13 = arith.constant dense<0.000000e+00> : vector<256x64xf32>
    %51 = tpu.matmul %48, %50, %cst_13 {dimension_numbers = #tpu.dot_dimension_numbers<[1], [0], [0], [1], [0, 0, 1, 1], [], []>} : vector<256x4xbf16>, vector<4x64xbf16>, vector<256x64xf32> -> vector<256x64xf32>
    %52 = arith.addf %45, %51 : vector<256x64xf32>
    %53 = vector.extract_strided_slice %1 {offsets = [2, 1, 0], sizes = [16, 16, 4], strides = [1, 1, 1]} : vector<18x18x4xf32> to vector<16x16x4xf32>
    %54 = vector.shape_cast %53 : vector<16x16x4xf32> to vector<256x4xf32>
    %55 = arith.truncf %54 : vector<256x4xf32> to vector<256x4xbf16>
    %56 = vector.extract_strided_slice %2 {offsets = [2, 1, 0, 0], sizes = [1, 1, 4, 64], strides = [1, 1, 1, 1]} : vector<3x3x4x64xbf16> to vector<1x1x4x64xbf16>
    %57 = vector.shape_cast %56 : vector<1x1x4x64xbf16> to vector<4x64xbf16>
    %cst_14 = arith.constant dense<0.000000e+00> : vector<256x64xf32>
    %58 = tpu.matmul %55, %57, %cst_14 {dimension_numbers = #tpu.dot_dimension_numbers<[1], [0], [0], [1], [0, 0, 1, 1], [], []>} : vector<256x4xbf16>, vector<4x64xbf16>, vector<256x64xf32> -> vector<256x64xf32>
    %59 = arith.addf %52, %58 : vector<256x64xf32>
    %60 = vector.extract_strided_slice %1 {offsets = [2, 2, 0], sizes = [16, 16, 4], strides = [1, 1, 1]} : vector<18x18x4xf32> to vector<16x16x4xf32>
    %61 = vector.shape_cast %60 : vector<16x16x4xf32> to vector<256x4xf32>
    %62 = arith.truncf %61 : vector<256x4xf32> to vector<256x4xbf16>
    %63 = vector.extract_strided_slice %2 {offsets = [2, 2, 0, 0], sizes = [1, 1, 4, 64], strides = [1, 1, 1, 1]} : vector<3x3x4x64xbf16> to vector<1x1x4x64xbf16>
    %64 = vector.shape_cast %63 : vector<1x1x4x64xbf16> to vector<4x64xbf16>
    %cst_15 = arith.constant dense<0.000000e+00> : vector<256x64xf32>
    %65 = tpu.matmul %62, %64, %cst_15 {dimension_numbers = #tpu.dot_dimension_numbers<[1], [0], [0], [1], [0, 0, 1, 1], [], []>} : vector<256x4xbf16>, vector<4x64xbf16>, vector<256x64xf32> -> vector<256x64xf32>
    %66 = arith.addf %59, %65 : vector<256x64xf32>
    %c0_16 = arith.constant 0 : index
    %c0_17 = arith.constant 0 : index
    %67 = vector.load %arg4[%c0_16, %c0_17] : memref<1x64xf32, #tpu.memory_space<vmem>>, vector<1x64xf32>
    %68 = vector.broadcast %67 : vector<1x64xf32> to vector<256x64xf32>
    %69 = arith.mulf %66, %68 : vector<256x64xf32>
    %c0_18 = arith.constant 0 : index
    %c0_19 = arith.constant 0 : index
    %70 = vector.load %arg5[%c0_18, %c0_19] : memref<1x64xf32, #tpu.memory_space<vmem>>, vector<1x64xf32>
    %71 = vector.broadcast %70 : vector<1x64xf32> to vector<256x64xf32>
    %72 = arith.addf %69, %71 : vector<256x64xf32>
    %c0_20 = arith.constant 0 : index
    %c0_21 = arith.constant 0 : index
    %c0_22 = arith.constant 0 : index
    %73 = vector.load %arg6[%c0_20, %c0_21, %c0_22] : memref<1x256x64xf32, #tpu.memory_space<vmem>>, vector<1x256x64xf32>
    %74 = vector.shape_cast %73 : vector<1x256x64xf32> to vector<256x64xf32>
    %75 = vector.shape_cast %72 : vector<256x64xf32> to vector<1x256x64xf32>
    tpu.vector_store %arg6[%c0_20, %c0_21, %c0_22], %75 {strides = array<i32>} : memref<1x256x64xf32, #tpu.memory_space<vmem>>, vector<1x256x64xf32>,
    return
  }
  func.func @transform_0(%arg0: i32, %arg1: i32) -> (i32, i32, i32, i32) {
    %c0_i32 = arith.constant 0 : i32
    %c0_i32_0 = arith.constant 0 : i32
    %c0_i32_1 = arith.constant 0 : i32
    %c0_i32_2 = arith.constant 0 : i32
    return %arg0, %c0_i32, %c0_i32_0, %c0_i32_1 : i32, i32, i32, i32
  }
  func.func @transform_1(%arg0: i32, %arg1: i32) -> (i32, i32, i32, i32) {
    %c0_i32 = arith.constant 0 : i32
    %c0_i32_0 = arith.constant 0 : i32
    %c0_i32_1 = arith.constant 0 : i32
    %c0_i32_2 = arith.constant 0 : i32
    return %c0_i32, %c0_i32_0, %c0_i32_1, %arg1 : i32, i32, i32, i32
  }
  func.func @transform_2(%arg0: i32, %arg1: i32) -> (i32, i32) {
    %c0_i32 = arith.constant 0 : i32
    %c0_i32_0 = arith.constant 0 : i32
    return %c0_i32, %arg1 : i32, i32
  }
  func.func @transform_3(%arg0: i32, %arg1: i32) -> (i32, i32) {
    %c0_i32 = arith.constant 0 : i32
    %c0_i32_0 = arith.constant 0 : i32
    return %c0_i32, %arg1 : i32, i32
  }
  func.func @transform_4(%arg0: i32, %arg1: i32) -> (i32, i32, i32) {
    %c0_i32 = arith.constant 0 : i32
    %c0_i32_0 = arith.constant 0 : i32
    return %arg0, %c0_i32, %arg1 : i32, i32, i32
  }
}

</mosaic_0001>

<bundles_post_ra>
// kernel: conv_block_singlenorelu_forward.1
= control target key start
LH: loop header
LB: loop body
LE: loop exit
PB: predicated region body
PF: predicated region fallthrough
CT: control target
= control target key end

     0   :  { %9 = vsyncpa [#allocation3], 0  ;;  %s5098_s0 = inlined_call_operand.vmem [shape: f32[2,18,18,4], index: 0, kind: input, shape index: {}]   ;;  %s5099_s1 = inlined_call_operand.vmem [shape: bf16[3,3,4,64], index: 1, kind: input, shape index: {}]   ;;  %s5100_s2 = inlined_call_operand.vmem [shape: f32[1,64], index: 2, kind: input, shape index: {}]   ;;  %s5101_s3 = inlined_call_operand.vmem [shape: f32[1,64], index: 3, kind: input, shape index: {}]   ;;  %s5102_s4 = inlined_call_operand.hbm [shape: f32[2,256,64], index: 4, kind: output, shape index: {}]  }
   0x1   :  { %11 = vsyncpa [#allocation3 + $0x1], 0  ;;  %s3579_s15 = smov 0   ;;  %s3581_s16 = smov 0  }
   0x2   :  { %s3583_s17 = smov 0   ;;  %s3585_s18 = smov 0  }
   0x3   :  { %s3587_s19 = smov 0   ;;  %s3589_s20 = smov 0  }
   0x4 LB: > { %s2782_s21 = sadd.s32 4294967295, %s3549_s20   ;;  %s2783_s22 = sadd.s32 4294967294, %s3549_s20   ;;  %s3549_s20 = sphi %s3589_s20, %s17_s20   ;;  %s3545_s19 = sphi %s3587_s19, %s5273_s19   ;;  %s3541_s18 = sphi %s3585_s18, %s5272_s18   ;;  %s3537_s17 = sphi %s3583_s17, %s5271_s17   ;;  %s3533_s16 = sphi %s3581_s16, %s5270_s16   ;;  %s3529_s15 = sphi %s3579_s15, %s5269_s15  }
   0x5   : > { %s29_s23 = sadd.s32 1, %s3545_s19  ;;  %s142_s24 = sadd.s32 1, %s3537_s17 }
   0x6   : > { %p31_p0 = scmp.ge.s32.totalorder %s29_s23, 2  ;;  %p152_p1 = scmp.ne.s32.totalorder %s3537_s17, %s3533_s16 }
   0x7   : > { %p153_p2 = scmp.eq.s32.totalorder %s2782_s21, 1  ;;  %p158_p3 = scmp.ne.s32.totalorder %s3533_s16, %s3529_s15 }
   0x8   : > { %s5275_s23 = smov (%p31_p0, %s29_s23), 0  ;;  %p159_p5 = scmp.eq.s32.totalorder %s2783_s22, 1 }
   0x9   : > { %p3619_p4 = por %p153_p2, %p152_p1  ;;  %s137_s26 = ssub.s32 %s3545_s19, %s5275_s23 }
   0xa   : > { %p2789_p6 = scmp.ge.s32.totalorder %s3549_s20, 1  ;;  %p140_p7 = scmp.eq.s32.totalorder %s137_s26, 0 }
   0xb   : > { %p3626_p8 = por %p159_p5, %p158_p3  ;;  %p204_p9 = scmp.lt.s32.totalorder %s3549_s20, 3 }
   0xc   : > { %s3632_s28 = scalar_select %p140_p7, %s3537_s17, %s142_s24  }
   0xd   : > { %p205_p10 = pnand %p2789_p6, %p204_p9 }
   0xf   : > { %208 = sbr.rel (%p205_p10) target bundleno = 539 (0x21b), region = 36 }
  0x14   : > { %v311_v0 = vld [vmem:[%s5099_s1 + $0x2] sm:$0x3]  ;;  %vm561_vm0 = vcmask 1041408   ;;  %p240_p11 = scmp.lt.s32.totalorder %s3541_s18, 1  ;;  %v310_v2 = vld [vmem:[%s5099_s1] sm:$0x3] }
  0x15   : > { %3406 = vmatprep.subr.msk.bf16.mxu1 %vm561_vm0, %v311_v0  ;;  %3405 = vmatprep.subr.msk.bf16.mxu0 %vm561_vm0, %v311_v0  ;;  %v563_v1 = vsel %vm561_vm0, %v311_v0, 0  ;;  %v312_v3 = vld [vmem:[%s5099_s1 + $0x4] sm:$0x3]  ;;  %vm383_vm1 = vcmask 1046528   ;;  %vm512_vm2 = vcmask 31744   ;;  %v775_v30 = vsel %vm561_vm0, %v310_v2, 0 }
  0x16   : > { %3404 = vmatpush3.bf16.msra.mxu1 %v563_v1  ;;  %3098 = vmatpush3.bf16.msra.mxu0 %v563_v1  ;;  %s241_s9 = scalar_select %p240_p11, %s3541_s18, 1  ;;  %v1116_v37 = vsel %vm561_vm0, %v312_v3, 0  ;;  %v3749_v51 = vld [vmem:[%s5099_s1 + $0x8] sm:$0x3]  ;;  %vm938_vm3 = vcmask 1045504   ;;  %vm2623_vm4 = vcmask 523264  }
  0x17   : > { %3407 = vmatprep.subr.msk.bf16.mxu1 %vm561_vm0, %v310_v2  ;;  %3408 = vmatprep.subr.msk.bf16.mxu0 %vm561_vm0, %v312_v3  ;;  %s2943_s24 = sshll.u32 %s3541_s18, 12  ;;  %s3551_s7 = smov [#allocation2]  }
  0x18   : > { %s3415_s10 = smul.u32 432, %s241_s9  ;;  %s5042_s5 = scalar_lea.hbm %s5102_s4, %s2943_s24 }
  0x19   : > { %s3477_s8 = sshll.u32 %s3551_s7, 4  ;;  %s3478_s8 = int_to_ptr.vmem [resolvable:$false] %s3477_s8 }
  0x1a   : > { %s3653_s13 = scalar_lea.vmem %s5098_s0, %s3415_s10  ;;  %s237_s10 = sand.u32 1, %s3533_s16  }
  0x1b   : > { %v3656_v4 = vld [vmem:[%s3653_s13] sm:$0xff]  ;;  %v3659_v5 = vld [vmem:[%s3653_s13 + $0x8] sm:$0xff]  ;;  %v3662_v6 = vld [vmem:[%s3653_s13 + $0x10] sm:$0x3]  ;;  %s5053_s18 = scalar_lea.sflag [#allocation3], %s237_s10  ;;  %s3479_s9 = scalar_lea.vmem %s3478_s8, 8192 }
  0x1c   : > { %v384_v7 = vrot.slane %v3656_v4, 1  ;;  %v385_v8 = vrot.slane %v3659_v5, 1  ;;  %v387_v9 = vrot.slane %v3662_v6, 1  ;;  %v3668_v10 = vld [vmem:[%s3653_s13 + $0xc0] sm:$0xff]  ;;  %v3671_v11 = vld [vmem:[%s3653_s13 + $0xc8] sm:$0xff]  ;;  %v3682_v18 = vld [vmem:[%s3653_s13 + $0x18] sm:$0xff] }
  0x1d   : > { %v3674_v12 = vld [vmem:[%s3653_s13 + $0xd0] sm:$0x3]  ;;  %v424_v13 = vrot.slane %v3668_v10, 1  ;;  %v425_v14 = vrot.slane %v3671_v11, 1  ;;  %v3685_v19 = vld [vmem:[%s3653_s13 + $0x20] sm:$0xff]  ;;  %v389_v23 = vrot.slane %v3682_v18, 1 }
  0x1e   : > { %5133 = vst [vmem:[#allocation5_spill] sm:$0xff] %v3674_v12  ;;  %v386_v15 = vsel %vm383_vm1, %v384_v7, %v385_v8  ;;  %v388_v16 = vsel %vm383_vm1, %v385_v8, %v387_v9  ;;  %v427_v17 = vrot.slane %v3674_v12, 1  ;;  %v3688_v20 = vld [vmem:[%s3653_s13 + $0x28] sm:$0x3]  ;;  %v390_v24 = vrot.slane %v3685_v19, 1  ;;  %v3694_v25 = vld [vmem:[%s3653_s13 + $0xd8] sm:$0xff] }
  0x1f   : > { %v496_v21 = vpack.c.bf16 %v388_v16, %v386_v15  ;;  %v426_v22 = vsel %vm383_vm1, %v424_v13, %v425_v14  ;;  %v3697_v26 = vld [vmem:[%s3653_s13 + $0xe0] sm:$0xff]  ;;  %v3700_v27 = vld [vmem:[%s3653_s13 + $0xe8] sm:$0x3]  ;;  %v392_v29 = vrot.slane %v3688_v20, 1  ;;  %v3706_v31 = vld [vmem:[%s3653_s13 + $0x30] sm:$0xff]  ;;  %v429_v36 = vrot.slane %v3694_v25, 1 }
  0x20   : > { %5134 = vst [vmem:[#allocation6_spill] sm:$0xff] %v3700_v27  ;;  %v428_v28 = vsel %vm383_vm1, %v425_v14, %v427_v17  ;;  %v3709_v32 = vld [vmem:[%s3653_s13 + $0x38] sm:$0xff]  ;;  %v3712_v33 = vld [vmem:[%s3653_s13 + $0xf0] sm:$0xff]  ;;  %v391_v35 = vsel %vm383_vm1, %v389_v23, %v390_v24  ;;  %v3721_v38 = vld [vmem:[%s3653_s13 + $0x40] sm:$0x3]  ;;  %v430_v41 = vrot.slane %v3697_v26, 1 }
  0x21   : > { %3099 = vmatprep.mubr.msk.bf16.mxu0 %vm512_vm2, %v496_v21  ;;  %v3715_v34 = vpack.c.bf16 %v428_v28, %v426_v22  ;;  %v3724_v39 = vld [vmem:[%s3653_s13 + $0xf8] sm:$0xff]  ;;  %v393_v40 = vsel %vm383_vm1, %v390_v24, %v392_v29  ;;  %v432_v42 = vrot.slane %v3700_v27, 1  ;;  %v394_v43 = vrot.slane %v3706_v31, 1  ;;  %v3731_v44 = vld [vmem:[%s3653_s13 + $0x100] sm:$0x3]  ;;  %v3734_v45 = vld [vmem:[%s3653_s13 + $0x48] sm:$0xff] }
  0x22   : > { %5136 = vst [vmem:[#allocation8_spill] sm:$0xff] %v3731_v44  ;;  %v3738_v46 = vpack.c.bf16 %v393_v40, %v391_v35  ;;  %v395_v47 = vrot.slane %v3709_v32, 1  ;;  %v397_v48 = vrot.slane %v3721_v38, 1  ;;  %v434_v49 = vrot.slane %v3712_v33, 1  ;;  %v3744_v50 = vld [vmem:[%s3653_s13 + $0x50] sm:$0xff]  ;;  %v3759_v57 = vld [vmem:[%s3653_s13 + $0x108] sm:$0xff] }
  0x23   : > { %5135 = vst [vmem:[#allocation7_spill] sm:$0xff] %v3715_v34  ;;  %3115 = vmatprep.mubr.msk.bf16.mxu1 %vm512_vm2, %v3715_v34  ;;  %v431_v52 = vsel %vm383_vm1, %v429_v36, %v430_v41  ;;  %v433_v53 = vsel %vm383_vm1, %v430_v41, %v432_v42  ;;  %v435_v54 = vrot.slane %v3724_v39, 1  ;;  %v437_v55 = vrot.slane %v3731_v44, 1  ;;  %v3756_v56 = vld [vmem:[%s3653_s13 + $0x58] sm:$0x3]  ;;  %v3762_v58 = vld [vmem:[%s3653_s13 + $0x110] sm:$0xff] }
  0x24   : > { %5137 = vst [vmem:[#allocation9_spill] sm:$0xff] %v3738_v46  ;;  %3100 = vmatmul.mubr.msk.bf16.vlgmr.msra.gmra.mxu0 %vm512_vm2, %v3738_v46  ;;  %v3766_v59 = vpack.c.bf16 %v433_v53, %v431_v52  ;;  %v396_v60 = vsel %vm383_vm1, %v394_v43, %v395_v47  ;;  %v398_v61 = vsel %vm383_vm1, %v395_v47, %v397_v48  ;;  %v399_v62 = vrot.slane %v3734_v45, 1  ;;  %v3772_v63 = vld [vmem:[%s3653_s13 + $0x118] sm:$0x3]  ;;  %v3775_v0 = vld [vmem:[%s3653_s13 + $0x60] sm:$0xff]  ;;  %v3778_v1 = vld [vmem:[%s3653_s13 + $0x68] sm:$0xff] }
  0x25   : > { %5139 = vst [vmem:[#allocation11_spill] sm:$0xff] %v3772_v63  ;;  %3166 = vmatpush3.bf16.msra.mxu0 %v1116_v37  ;;  %v3780_v2 = vpack.c.bf16 %v398_v61, %v396_v60  ;;  %v436_v3 = vsel %vm383_vm1, %v434_v49, %v435_v54  ;;  %v438_v7 = vsel %vm383_vm1, %v435_v54, %v437_v55  ;;  %v400_v8 = vrot.slane %v3744_v50, 1  ;;  %v3786_v9 = vld [vmem:[%s3653_s13 + $0x70] sm:$0x3]  ;;  %v3789_v13 = vld [vmem:[%s3653_s13 + $0x120] sm:$0xff]  ;;  %v3804_v22 = vld [vmem:[%s3653_s13 + $0x128] sm:$0xff] }
  0x26   : > { %5138 = vst [vmem:[#allocation10_spill] sm:$0xff] %v3766_v59  ;;  %v3794_v14 = vld [vmem:[%s5099_s1 + $0x6] sm:$0x3]  ;;  %3116 = vmatmul.mubr.msk.bf16.vlgmr.msra.gmra.mxu1 %vm512_vm2, %v3766_v59  ;;  %v3798_v15 = vpack.c.bf16 %v438_v7, %v436_v3  ;;  %v402_v16 = vrot.slane %v3756_v56, 1  ;;  %v439_v17 = vrot.slane %v3759_v57, 1  ;;  %v440_v21 = vrot.slane %v3762_v58, 1  ;;  %3410 = vmatprep.subr.msk.bf16.mxu0 %vm561_vm0, %v3749_v51 }
  0x27   : > { %5140 = vst [vmem:[#allocation12_spill] sm:$0xff] %v3780_v2  ;;  %3132 = vmatpush3.bf16.msra.mxu1 %v775_v30  ;;  %3103 = vmatprep.mubr.msk.bf16.mxu0 %vm512_vm2, %v3780_v2  ;;  %v401_v23 = vsel %vm383_vm1, %v399_v62, %v400_v8  ;;  %v442_v24 = vrot.slane %v3772_v63, 1  ;;  %v404_v28 = vrot.slane %v3775_v0, 1  ;;  %v405_v29 = vrot.slane %v3778_v1, 1  ;;  %v3815_v35 = vld [vmem:[%s3653_s13 + $0x130] sm:$0x3] }
  0x28   : > { %5141 = vst [vmem:[#allocation13_spill] sm:$0xff] %v3798_v15  ;;  %5142 = vst [vmem:[#allocation14_spill] sm:$0xff] %v3815_v35  ;;  %v3818_v36 = vld [vmem:[%s3653_s13 + $0x78] sm:$0xff]  ;;  %3119 = vmatprep.mubr.msk.bf16.mxu1 %vm512_vm2, %v3798_v15  ;;  %v403_v30 = vsel %vm383_vm1, %v400_v8, %v402_v16  ;;  %v441_v37 = vsel %vm383_vm1, %v439_v17, %v440_v21  ;;  %v407_v40 = vrot.slane %v3786_v9, 1  ;;  %v444_v41 = vrot.slane %v3789_v13, 1  ;;  %v3827_v42 = vld [vmem:[%s3653_s13 + $0x80] sm:$0xff] }
  0x29   : > { %v3830_v43 = vld [vmem:[%s3653_s13 + $0x88] sm:$0x3]  ;;  %3409 = vmatprep.subr.msk.bf16.mxu1 %vm561_vm0, %v3794_v14  ;;  %v3834_v47 = vpack.c.bf16 %v403_v30, %v401_v23  ;;  %v443_v48 = vsel %vm383_vm1, %v440_v21, %v442_v24  ;;  %v406_v49 = vsel %vm383_vm1, %v404_v28, %v405_v29  ;;  %v445_v52 = vrot.slane %v3804_v22, 1  ;;  %v3840_v53 = vld [vmem:[%s3653_s13 + $0x138] sm:$0xff]  ;;  %v3843_v54 = vld [vmem:[%s3653_s13 + $0x140] sm:$0xff] }
  0x2a   : > { %v3846_v55 = vld [vmem:[%s3653_s13 + $0x148] sm:$0x3]  ;;  %v3848_v60 = vpack.c.bf16 %v443_v48, %v441_v37  ;;  %v408_v61 = vsel %vm383_vm1, %v405_v29, %v407_v40  ;;  %v447_v62 = vrot.slane %v3815_v35, 1  ;;  %v409_v3 = vrot.slane %v3818_v36, 1  ;;  %v3854_v7 = vld [vmem:[%s3653_s13 + $0x90] sm:$0xff]  ;;  %v3862_v23 = vld [vmem:[%s3653_s13 + $0x98] sm:$0xff] }
  0x2b   : > { %5143 = vst [vmem:[#allocation15_spill] sm:$0xff] %v3834_v47  ;;  %5144 = vst [vmem:[#allocation16_spill] sm:$0xff] %v3846_v55  ;;  %v3856_v8 = vpack.c.bf16 %v408_v61, %v406_v49  ;;  %v446_v16 = vsel %vm383_vm1, %v444_v41, %v445_v52  ;;  %v410_v17 = vrot.slane %v3827_v42, 1  ;;  %v412_v21 = vrot.slane %v3830_v43, 1  ;;  %v3865_v24 = vld [vmem:[%s3653_s13 + $0x150] sm:$0xff]  ;;  %v3877_v41 = vld [vmem:[%s3653_s13 + $0x158] sm:$0xff] }
  0x2c   : > { %5145 = vst [vmem:[#allocation17_spill] sm:$0xff] %v3848_v60  ;;  %3104 = vmatmul.mubr.msk.bf16.gmra.mxu0 %vm512_vm2, %v3834_v47  ;;  %v448_v28 = vsel %vm383_vm1, %v445_v52, %v447_v62  ;;  %v449_v29 = vrot.slane %v3840_v53, 1  ;;  %v450_v30 = vrot.slane %v3843_v54, 1  ;;  %v452_v37 = vrot.slane %v3846_v55, 1  ;;  %v3874_v40 = vld [vmem:[%s3653_s13 + $0xa0] sm:$0x3] }
  0x2d   : > { %5146 = vst [vmem:[#allocation18_spill] sm:$0xff] %v3856_v8  ;;  %3107 = vmatprep.mubr.msk.bf16.mxu0 %vm512_vm2, %v3856_v8  ;;  %v3881_v48 = vpack.c.bf16 %v448_v28, %v446_v16  ;;  %v411_v49 = vsel %vm383_vm1, %v409_v3, %v410_v17  ;;  %v413_v52 = vsel %vm383_vm1, %v410_v17, %v412_v21  ;;  %v414_v61 = vrot.slane %v3854_v7, 1  ;;  %v3887_v62 = vld [vmem:[%s3653_s13 + $0x160] sm:$0x3]  ;;  %v3890_v15 = vld [vmem:[%s3653_s13 + $0xa8] sm:$0xff]  ;;  %v3899_v17 = vld [vmem:[%s3653_s13 + $0xb0] sm:$0xff] }
  0x2e   : > { %5148 = vst [vmem:[#allocation20_spill] sm:$0xff] %v3887_v62  ;;  %5149 = vst [vmem:[#allocation21_spill] sm:$0xff] %v3890_v15  ;;  %v939_v59 = vrot.slane %v3656_v4, 2  ;;  %v940_v34 = vrot.slane %v3659_v5, 2  ;;  %3120 = vmatmul.mubr.msk.bf16.gmra.mxu1 %vm512_vm2, %v3848_v60  ;;  %v451_v3 = vsel %vm383_vm1, %v449_v29, %v450_v30  ;;  %v415_v16 = vrot.slane %v3862_v23, 1  ;;  %v3916_v35 = vld [vmem:[%s3653_s13 + $0x168] sm:$0xff] }
  0x2f   : > { %5147 = vst [vmem:[#allocation19_spill] sm:$0xff] %v3881_v48  ;;  %v3902_v21 = vld [vmem:[%s3653_s13 + $0xb8] sm:$0x3]  ;;  %3123 = vmatprep.mubr.msk.bf16.mxu1 %vm512_vm2, %v3881_v48  ;;  %v453_v28 = vsel %vm383_vm1, %v450_v30, %v452_v37  ;;  %v417_v8 = vrot.slane %v3874_v40, 1  ;;  %v454_v47 = vrot.slane %v3865_v24, 1  ;;  %v455_v60 = vrot.slane %v3877_v41, 1 }
  0x30   : > { %v3910_v2 = vpack.c.bf16 %v413_v52, %v411_v49  ;;  %v416_v29 = vsel %vm383_vm1, %v414_v61, %v415_v16  ;;  %v457_v46 = vrot.slane %v3887_v62, 1  ;;  %v419_v55 = vrot.slane %v3890_v15, 1  ;;  %v3919_v63 = vld [vmem:[%s3653_s13 + $0x170] sm:$0xff]  ;;  %v3922_v48 = vld [vmem:[%s3653_s13 + $0x178] sm:$0x3] }
  0x31   : > { %v418_v30 = vsel %vm383_vm1, %v415_v16, %v417_v8  ;;  %v456_v37 = vsel %vm383_vm1, %v454_v47, %v455_v60  ;;  %v420_v44 = vrot.slane %v3899_v17, 1  ;;  %v422_v49 = vrot.slane %v3902_v21, 1 }
  0x32   : > { %v942_v52 = vrot.slane %v3662_v6, 2  ;;  %v3929_v61 = vpack.c.bf16 %v453_v28, %v451_v3  ;;  %v3931_v62 = vpack.c.bf16 %v418_v30, %v416_v29  ;;  %v458_v27 = vsel %vm383_vm1, %v455_v60, %v457_v46 }
  0x33   : > { %v3934_v12 = vpack.c.bf16 %v458_v27, %v456_v37  ;;  %v459_v15 = vrot.slane %v3916_v35, 1  ;;  %v460_v8 = vrot.slane %v3919_v63, 1  ;;  %v462_v47 = vrot.slane %v3922_v48, 1 }
  0x34   : > { %3108 = vmatmul.mubr.msk.bf16.gmra.mxu0 %vm512_vm2, %v3910_v2  ;;  %v421_v6 = vsel %vm383_vm1, %v419_v55, %v420_v44  ;;  %v423_v3 = vsel %vm383_vm1, %v420_v44, %v422_v49  ;;  %v941_v27 = vsel %vm938_vm3, %v939_v59, %v940_v34  ;;  %v943_v46 = vsel %vm938_vm3, %v940_v34, %v942_v52 }
  0x35   : > { %3111 = vmatprep.mubr.msk.bf16.mxu0 %vm512_vm2, %v3931_v62  ;;  %v461_v60 = vsel %vm383_vm1, %v459_v15, %v460_v8  ;;  %v463_v16 = vsel %vm383_vm1, %v460_v8, %v462_v47  ;;  %v3953_v28 = vpack.c.bf16 %v423_v3, %v421_v6  ;;  %v944_v55 = vrot.slane %v3682_v18, 2 }
  0x36   : > { %3124 = vmatmul.mubr.msk.bf16.gmra.mxu1 %vm512_vm2, %v3929_v61  ;;  %v945_v44 = vrot.slane %v3685_v19, 2  ;;  %v947_v29 = vrot.slane %v3688_v20, 2  ;;  %v1051_v30 = vpack.c.bf16 %v943_v46, %v941_v27  ;;  %v3958_v37 = vpack.c.bf16 %v463_v16, %v461_v60 }
  0x37   : > { %3127 = vmatprep.mubr.msk.bf16.mxu1 %vm512_vm2, %v3934_v12  ;;  %v949_v34 = vrot.slane %v3706_v31, 2  ;;  %v950_v59 = vrot.slane %v3709_v32, 2  ;;  %v952_v49 = vrot.slane %v3721_v38, 2  ;;  %v319_v15 = vpack.c.bf16 %v3659_v5, %v3656_v4 }
  0x38   : > { %5150 = vst [vmem:[#allocation22_spill] sm:$0xff] %v3958_v37  ;;  %v946_v52 = vsel %vm938_vm3, %v944_v55, %v945_v44  ;;  %v948_v20 = vsel %vm938_vm3, %v945_v44, %v947_v29  ;;  %v1526_v4 = vsel %vm561_vm0, %v3749_v51, 0  ;;  %v3979_v5 = vpack.c.bf16 %v3685_v19, %v3682_v18 }
  0x39   : > { %v951_v8 = vsel %vm938_vm3, %v949_v34, %v950_v59  ;;  %v953_v47 = vsel %vm938_vm3, %v950_v59, %v952_v49  ;;  %v3981_v38 = vpack.c.bf16 %v948_v20, %v946_v52  ;;  %v954_v6 = vrot.slane %v3734_v45, 2 }
  0x3a   : > { %v3986_v3 = vpack.c.bf16 %v3671_v11, %v3668_v10  ;;  %v3988_v27 = vpack.c.bf16 %v953_v47, %v951_v8  ;;  %v955_v46 = vrot.slane %v3744_v50, 2  ;;  %v957_v60 = vrot.slane %v3756_v56, 2  ;;  %v4010_v56 = vld [vmem:[%s5099_s1 + $0xc] sm:$0x3] }
  0x3b   : > { %v3994_v51 = vpack.c.bf16 %v3697_v26, %v3694_v25  ;;  %v959_v18 = vrot.slane %v3775_v0, 2  ;;  %v960_v19 = vrot.slane %v3778_v1, 2  ;;  %v962_v16 = vrot.slane %v3786_v9, 2 }
  0x3c   : > { %3112 = vmatmul.mubr.msk.bf16.gmra.mxu0 %vm512_vm2, %v3953_v28  ;;  %v4001_v55 = vpack.c.bf16 %v3724_v39, %v3712_v33  ;;  %v4005_v44 = vpack.c.bf16 %v3709_v32, %v3706_v31  ;;  %v1316_v29 = vsel %vm561_vm0, %v3794_v14, 0  ;;  %v956_v9 = vsel %vm938_vm3, %v954_v6, %v955_v46 }
  0x3d   : > { %3167 = vmatprep.mubr.msk.bf16.mxu0 %vm512_vm2, %v1051_v30  ;;  %v958_v31 = vsel %vm938_vm3, %v955_v46, %v957_v60  ;;  %v4022_v32 = vpack.c.bf16 %v3762_v58, %v3759_v57  ;;  %v4027_v30 = vld [vmem:[%s5099_s1 + $0xa] sm:$0x3]  ;;  %v961_v14 = vsel %vm938_vm3, %v959_v18, %v960_v19  ;;  %v963_v34 = vsel %vm938_vm3, %v960_v19, %v962_v16 }
  0x3e   : > { %3128 = vmatmul.mubr.msk.bf16.gmra.mxu1 %vm512_vm2, %v3958_v37  ;;  %v4035_v59 = vpack.c.bf16 %v3804_v22, %v3789_v13  ;;  %v4043_v49 = vpack.c.bf16 %v3744_v50, %v3734_v45  ;;  %v4049_v52 = vpack.c.bf16 %v3843_v54, %v3840_v53  ;;  %v4053_v20 = vpack.c.bf16 %v963_v34, %v961_v14  ;;  %v5152_v34 = vld [vmem:[#allocation5_spill] sm:$0xff] }
  0x3f   : > { %3133 = vmatprep.mubr.msk.bf16.mxu1 %vm512_vm2, %v319_v15  ;;  %v4045_v15 = vpack.c.bf16 %v958_v31, %v956_v9  ;;  %v964_v8 = vrot.slane %v3818_v36, 2  ;;  %v965_v47 = vrot.slane %v3827_v42, 2  ;;  %v969_v45 = vrot.slane %v3854_v7, 2 }
  0x40   : > { %v970_v50 = vrot.slane %v3862_v23, 2  ;;  %v972_v6 = vrot.slane %v3874_v40, 2  ;;  %v4063_v46 = vpack.c.bf16 %v3877_v41, %v3865_v24  ;;  %v4067_v60 = vpack.c.bf16 %v3778_v1, %v3775_v0 }
  0x41   : > { %v4071_v18 = vpack.c.bf16 %v3919_v63, %v3916_v35  ;;  %v975_v31 = vrot.slane %v3899_v17, 2  ;;  %v977_v14 = vrot.slane %v3902_v21, 2 }
  0x42   : > { %v971_v0 = vsel %vm938_vm3, %v969_v45, %v970_v50  ;;  %v973_v1 = vsel %vm938_vm3, %v970_v50, %v972_v6  ;;  %v980_v45 = vrot.slane %v3671_v11, 2  ;;  %v4101_v50 = vpack.c.bf16 %v3862_v23, %v3854_v7 }
  0x43   : > { %v4087_v16 = vpack.c.bf16 %v973_v1, %v971_v0  ;;  %v978_v6 = vsel %vm938_vm3, %v975_v31, %v977_v14  ;;  %v984_v7 = vrot.slane %v3694_v25, 2  ;;  %v985_v23 = vrot.slane %v3697_v26, 2 }
  0x44   : > { %3168 = vmatmul.mubr.msk.bf16.vlgmr.msra.gmra.mxu0 %vm512_vm2, %v3981_v38  ;;  %v989_v1 = vrot.slane %v3712_v33, 2 }
  0x45   : > { %3234 = vmatpush3.bf16.msra.mxu0 %v1526_v4  ;;  %3171 = vmatprep.mubr.msk.bf16.mxu0 %vm512_vm2, %v3988_v27  ;;  %v967_v4 = vrot.slane %v3830_v43, 2  ;;  %v966_v43 = vsel %vm938_vm3, %v964_v8, %v965_v47  ;;  %v982_v8 = vrot.slane %v5152_v34, 2  ;;  %v986_v25 = vsel %vm938_vm3, %v984_v7, %v985_v23 }
  0x46   : > { %3134 = vmatmul.mubr.msk.bf16.vlgmr.msra.gmra.mxu1 %vm512_vm2, %v3979_v5  ;;  %3412 = vmatprep.subr.msk.bf16.mxu0 %vm561_vm0, %v4010_v56  ;;  %v994_v34 = vrot.slane %v3759_v57, 2 }
  0x47   : > { %3200 = vmatpush3.bf16.msra.mxu1 %v1316_v29  ;;  %3137 = vmatprep.mubr.msk.bf16.mxu1 %vm512_vm2, %v4005_v44  ;;  %v968_v40 = vsel %vm938_vm3, %v965_v47, %v967_v4  ;;  %v5151_v29 = vld [vmem:[#allocation21_spill] sm:$0xff]  ;;  %v4095_v47 = vpack.c.bf16 %v3827_v42, %v3818_v36  ;;  %v979_v4 = vrot.slane %v3668_v10, 2  ;;  %v983_v11 = vsel %vm938_vm3, %v980_v45, %v982_v8 }
  0x48   : > { %3411 = vmatprep.subr.msk.bf16.mxu1 %vm561_vm0, %v4027_v30  ;;  %v4085_v19 = vpack.c.bf16 %v968_v40, %v966_v43  ;;  %v974_v9 = vrot.slane %v5151_v29, 2  ;;  %v5153_v43 = vld [vmem:[#allocation6_spill] sm:$0xff]  ;;  %v4124_v0 = vpack.c.bf16 %v3899_v17, %v5151_v29  ;;  %v995_v8 = vrot.slane %v3762_v58, 2 }
  0x49   : > { %v981_v10 = vsel %vm938_vm3, %v979_v4, %v980_v45  ;;  %v987_v40 = vrot.slane %v5153_v43, 2  ;;  %v5155_v4 = vld [vmem:[#allocation11_spill] sm:$0xff]  ;;  %v1004_v43 = vrot.slane %v3840_v53, 2 }
  0x4a   : > { %v976_v21 = vsel %vm938_vm3, %v974_v9, %v975_v31  ;;  %v4117_v42 = vpack.c.bf16 %v983_v11, %v981_v10  ;;  %v990_v9 = vrot.slane %v3724_v39, 2  ;;  %v5154_v31 = vld [vmem:[#allocation8_spill] sm:$0xff]  ;;  %v997_v45 = vrot.slane %v5155_v4, 2  ;;  %v5156_v10 = vld [vmem:[#allocation14_spill] sm:$0xff] }
  0x4b   : > { %v4115_v36 = vpack.c.bf16 %v978_v6, %v976_v21  ;;  %v992_v14 = vrot.slane %v5154_v31, 2  ;;  %v988_v26 = vsel %vm938_vm3, %v985_v23, %v987_v40  ;;  %v999_v21 = vrot.slane %v3789_v13, 2 }
  0x4c   : > { %3172 = vmatmul.mubr.msk.bf16.gmra.mxu0 %vm512_vm2, %v4045_v15  ;;  %v991_v17 = vsel %vm938_vm3, %v989_v1, %v990_v9  ;;  %v4141_v39 = vpack.c.bf16 %v988_v26, %v986_v25  ;;  %v1000_v6 = vrot.slane %v3804_v22, 2  ;;  %v1002_v11 = vrot.slane %v5156_v10, 2  ;;  %v5157_v1 = vld [vmem:[#allocation16_spill] sm:$0xff]  ;;  %v305_v10 = vld [vmem:[%s3653_s13 + $0x188] sm:$0xff] }
  0x4d   : > { %3175 = vmatprep.mubr.msk.bf16.mxu0 %vm512_vm2, %v4053_v20  ;;  %v993_v33 = vsel %vm938_vm3, %v990_v9, %v992_v14  ;;  %v996_v7 = vsel %vm938_vm3, %v994_v34, %v995_v8  ;;  %v998_v57 = vsel %vm938_vm3, %v995_v8, %v997_v45  ;;  %v1005_v40 = vrot.slane %v3843_v54, 2  ;;  %v5158_v25 = vld [vmem:[#allocation20_spill] sm:$0xff] }
  0x4e   : > { %3138 = vmatmul.mubr.msk.bf16.gmra.mxu1 %vm512_vm2, %v4043_v49  ;;  %v4143_v29 = vpack.c.bf16 %v993_v33, %v991_v17  ;;  %v1001_v58 = vsel %vm938_vm3, %v999_v21, %v1000_v6  ;;  %v1003_v13 = vsel %vm938_vm3, %v1000_v6, %v1002_v11  ;;  %v4163_v22 = vpack.c.bf16 %v998_v57, %v996_v7  ;;  %v304_v6 = vld [vmem:[%s3653_s13 + $0x180] sm:$0xff]  ;;  %v306_v11 = vld [vmem:[%s3653_s13 + $0x190] sm:$0x3] }
  0x4f   : > { %3141 = vmatprep.mubr.msk.bf16.mxu1 %vm512_vm2, %v4067_v60  ;;  %v4165_v23 = vpack.c.bf16 %v1003_v13, %v1001_v58  ;;  %v1007_v9 = vrot.slane %v5157_v1, 2  ;;  %v1009_v31 = vrot.slane %v3865_v24, 2  ;;  %v1010_v14 = vrot.slane %v3877_v41, 2  ;;  %v318_v1 = vld [vmem:[%s5099_s1 + $0x10] sm:$0x3] }
  0x50   : > { %v1012_v26 = vrot.slane %v5158_v25, 2  ;;  %v1006_v17 = vsel %vm938_vm3, %v1004_v43, %v1005_v40  ;;  %v1014_v34 = vrot.slane %v3916_v35, 2  ;;  %v1015_v8 = vrot.slane %v3919_v63, 2  ;;  %v5159_v43 = vld [vmem:[#allocation9_spill] sm:$0xff]  ;;  %v5164_v25 = vld [vmem:[#allocation10_spill] sm:$0xff] }
  0x51   : > { %v1008_v53 = vsel %vm938_vm3, %v1005_v40, %v1007_v9  ;;  %v1011_v54 = vsel %vm938_vm3, %v1009_v31, %v1010_v14  ;;  %v1017_v4 = vrot.slane %v3922_v48, 2  ;;  %v1721_v63 = vrot.slane %v304_v6, 2  ;;  %v5160_v9 = vld [vmem:[#allocation12_spill] sm:$0xff] }
  0x52   : > { %v1013_v24 = vsel %vm938_vm3, %v1010_v14, %v1012_v26  ;;  %v4185_v41 = vpack.c.bf16 %v1008_v53, %v1006_v17  ;;  %v1016_v45 = vsel %vm938_vm3, %v1014_v34, %v1015_v8  ;;  %v1722_v35 = vrot.slane %v305_v10, 2  ;;  %v5161_v14 = vld [vmem:[#allocation15_spill] sm:$0xff]  ;;  %v5165_v26 = vld [vmem:[#allocation13_spill] sm:$0xff] }
  0x53   : > { %v4187_v33 = vpack.c.bf16 %v1013_v24, %v1011_v54  ;;  %v1018_v21 = vsel %vm938_vm3, %v1015_v8, %v1017_v4  ;;  %v1724_v7 = vrot.slane %v306_v11, 2  ;;  %v1933_v40 = vsel %vm561_vm0, %v4010_v56, 0  ;;  %v5162_v56 = vld [vmem:[#allocation18_spill] sm:$0xff]  ;;  %v5166_v17 = vld [vmem:[#allocation17_spill] sm:$0xff]  ;;  %v5167_v53 = vld [vmem:[#allocation19_spill] sm:$0xff] }
  0x54   : > { %3176 = vmatmul.mubr.msk.bf16.gmra.mxu0 %vm512_vm2, %v4085_v19  ;;  %v4204_v48 = vpack.c.bf16 %v1018_v21, %v1016_v45  ;;  %v1723_v57 = vsel %vm938_vm3, %v1721_v63, %v1722_v35  ;;  %v1733_v31 = vsel %vm561_vm0, %v4027_v30, 0  ;;  %v5163_v30 = vld [vmem:[#allocation7_spill] sm:$0xff]  ;;  %v1514_v54 = vrot.slane %v304_v6, 1 }
  0x55   : > { %3179 = vmatprep.mubr.msk.bf16.mxu0 %vm512_vm2, %v4087_v16  ;;  %v1725_v58 = vsel %vm938_vm3, %v1722_v35, %v1724_v7  ;;  %v1515_v24 = vrot.slane %v305_v10, 1  ;;  %v1517_v34 = vrot.slane %v306_v11, 1  ;;  %v1311_v21 = vpack.c.bf16 %v305_v10, %v304_v6  ;;  %v4378_v7 = vld [vmem:[%s3653_s13 + $0x198] sm:$0xff] }
  0x56   : > { %3142 = vmatmul.mubr.msk.bf16.gmra.mxu1 %vm512_vm2, %v4095_v47  ;;  %v4211_v13 = vpack.c.bf16 %v1725_v58, %v1723_v57  ;;  %v2350_v63 = vsel %vm561_vm0, %v318_v1, 0  ;;  %v4381_v57 = vld [vmem:[%s3653_s13 + $0x1a0] sm:$0xff] }
  0x57   : > { %3145 = vmatprep.mubr.msk.bf16.mxu1 %vm512_vm2, %v4101_v50  ;;  %v1516_v8 = vsel %vm383_vm1, %v1514_v54, %v1515_v24  ;;  %v1518_v4 = vsel %vm383_vm1, %v1515_v24, %v1517_v34 }
  0x58   : > { %v4289_v45 = vpack.c.bf16 %v1518_v4, %v1516_v8 }
  0x5a   : > { %5168 = vst [vmem:[#allocation21_spill] sm:$0xff] %v4289_v45 }
  0x5c   : > { %3180 = vmatmul.mubr.msk.bf16.gmra.mxu0 %vm512_vm2, %v4115_v36 }
  0x5d   : > { %3183 = vmatprep.mubr.msk.bf16.mxu0 %vm512_vm2, %v4117_v42 }
  0x5e   : > { %3146 = vmatmul.mubr.msk.bf16.gmra.mxu1 %vm512_vm2, %v4124_v0 }
  0x5f   : > { %3149 = vmatprep.mubr.msk.bf16.mxu1 %vm512_vm2, %v3986_v3 }
  0x64   : > { %3184 = vmatmul.mubr.msk.bf16.gmra.mxu0 %vm512_vm2, %v4141_v39 }
  0x65   : > { %3187 = vmatprep.mubr.msk.bf16.mxu0 %vm512_vm2, %v4143_v29 }
  0x66   : > { %3150 = vmatmul.mubr.msk.bf16.gmra.mxu1 %vm512_vm2, %v3994_v51 }
  0x67   : > { %3153 = vmatprep.mubr.msk.bf16.mxu1 %vm512_vm2, %v4001_v55 }
  0x6c   : > { %3188 = vmatmul.mubr.msk.bf16.gmra.mxu0 %vm512_vm2, %v4163_v22 }
  0x6d   : > { %3191 = vmatprep.mubr.msk.bf16.mxu0 %vm512_vm2, %v4165_v23 }
  0x6e   : > { %3154 = vmatmul.mubr.msk.bf16.gmra.mxu1 %vm512_vm2, %v4022_v32 }
  0x6f   : > { %3157 = vmatprep.mubr.msk.bf16.mxu1 %vm512_vm2, %v4035_v59 }
  0x74   : > { %3192 = vmatmul.mubr.msk.bf16.gmra.mxu0 %vm512_vm2, %v4185_v41 }
  0x75   : > { %3195 = vmatprep.mubr.msk.bf16.mxu0 %vm512_vm2, %v4187_v33 }
  0x76   : > { %3158 = vmatmul.mubr.msk.bf16.gmra.mxu1 %vm512_vm2, %v4049_v52 }
  0x77   : > { %3161 = vmatprep.mubr.msk.bf16.mxu1 %vm512_vm2, %v4063_v46 }
  0x7c   : > { %3196 = vmatmul.mubr.msk.bf16.gmra.mxu0 %vm512_vm2, %v4204_v48 }
  0x7d   : > { %3235 = vmatprep.mubr.msk.bf16.mxu0 %vm512_vm2, %v5159_v43 }
  0x7e   : > { %3162 = vmatmul.mubr.msk.bf16.gmra.mxu1 %vm512_vm2, %v4071_v18 }
  0x7f   : > { %3201 = vmatprep.mubr.msk.bf16.mxu1 %vm512_vm2, %v3979_v5  ;;  %v317_v5 = vld [vmem:[%s5099_s1 + $0xe] sm:$0x3] }
  0x80   : > { %v2143_v35 = vsel %vm561_vm0, %v317_v5, 0 }
  0x84   : > { %3236 = vmatmul.mubr.msk.bf16.vlgmr.msra.gmra.mxu0 %vm512_vm2, %v5160_v9 }
  0x85   : > { %3302 = vmatpush3.bf16.msra.mxu0 %v1933_v40  ;;  %3239 = vmatprep.mubr.msk.bf16.mxu0 %vm512_vm2, %v5161_v14 }
  0x86   : > { %3202 = vmatmul.mubr.msk.bf16.vlgmr.msra.gmra.mxu1 %vm512_vm2, %v4005_v44  ;;  %3414 = vmatprep.subr.msk.bf16.mxu0 %vm561_vm0, %v318_v1 }
  0x87   : > { %3268 = vmatpush3.bf16.msra.mxu1 %v1733_v31  ;;  %3205 = vmatprep.mubr.msk.bf16.mxu1 %vm512_vm2, %v4043_v49 }
  0x88   : > { %3413 = vmatprep.subr.msk.bf16.mxu1 %vm561_vm0, %v317_v5 }
  0x8c   : > { %3240 = vmatmul.mubr.msk.bf16.gmra.mxu0 %vm512_vm2, %v5162_v56 }
  0x8d   : > { %3243 = vmatprep.mubr.msk.bf16.mxu0 %vm512_vm2, %v3910_v2 }
  0x8e   : > { %3206 = vmatmul.mubr.msk.bf16.gmra.mxu1 %vm512_vm2, %v4067_v60 }
  0x8f   : > { %3209 = vmatprep.mubr.msk.bf16.mxu1 %vm512_vm2, %v4095_v47 }
  0x94   : > { %3244 = vmatmul.mubr.msk.bf16.gmra.mxu0 %vm512_vm2, %v3931_v62 }
  0x95   : > { %3247 = vmatprep.mubr.msk.bf16.mxu0 %vm512_vm2, %v3953_v28 }
  0x96   : > { %3210 = vmatmul.mubr.msk.bf16.gmra.mxu1 %vm512_vm2, %v4101_v50 }
  0x97   : > { %3213 = vmatprep.mubr.msk.bf16.mxu1 %vm512_vm2, %v4124_v0 }
  0x9c   : > { %3248 = vmatmul.mubr.msk.bf16.gmra.mxu0 %vm512_vm2, %v5163_v30 }
  0x9d   : > { %3251 = vmatprep.mubr.msk.bf16.mxu0 %vm512_vm2, %v5164_v25 }
  0x9e   : > { %3214 = vmatmul.mubr.msk.bf16.gmra.mxu1 %vm512_vm2, %v3986_v3 }
  0x9f   : > { %3217 = vmatprep.mubr.msk.bf16.mxu1 %vm512_vm2, %v3994_v51 }
  0xa4   : > { %3252 = vmatmul.mubr.msk.bf16.gmra.mxu0 %vm512_vm2, %v5165_v26 }
  0xa5   : > { %3255 = vmatprep.mubr.msk.bf16.mxu0 %vm512_vm2, %v5166_v17 }
  0xa6   : > { %3218 = vmatmul.mubr.msk.bf16.gmra.mxu1 %vm512_vm2, %v4001_v55 }
  0xa7   : > { %3221 = vmatprep.mubr.msk.bf16.mxu1 %vm512_vm2, %v4022_v32 }
  0xac   : > { %3256 = vmatmul.mubr.msk.bf16.gmra.mxu0 %vm512_vm2, %v5167_v53 }
  0xad   : > { %3259 = vmatprep.mubr.msk.bf16.mxu0 %vm512_vm2, %v3929_v61 }
  0xae   : > { %3222 = vmatmul.mubr.msk.bf16.gmra.mxu1 %vm512_vm2, %v4035_v59 }
  0xaf   : > { %3225 = vmatprep.mubr.msk.bf16.mxu1 %vm512_vm2, %v4049_v52 }
  0xb4   : > { %3260 = vmatmul.mubr.msk.bf16.gmra.mxu0 %vm512_vm2, %v3934_v12 }
  0xb5   : > { %3263 = vmatprep.mubr.msk.bf16.mxu0 %vm512_vm2, %v3958_v37 }
  0xb6   : > { %3226 = vmatmul.mubr.msk.bf16.gmra.mxu1 %vm512_vm2, %v4063_v46 }
  0xb7   : > { %3229 = vmatprep.mubr.msk.bf16.mxu1 %vm512_vm2, %v4071_v18 }
  0xbc   : > { %3264 = vmatmul.mubr.msk.bf16.gmra.mxu0 %vm512_vm2, %v4289_v45 }
  0xbd   : > { %3303 = vmatprep.mubr.msk.bf16.mxu0 %vm512_vm2, %v4005_v44 }
  0xbe   : > { %3230 = vmatmul.mubr.msk.bf16.gmra.mxu1 %vm512_vm2, %v1311_v21 }
  0xbf   : > { %3269 = vmatprep.mubr.msk.bf16.mxu1 %vm512_vm2, %v3981_v38 }
  0xc4   : > { %3304 = vmatmul.mubr.msk.bf16.vlgmr.msra.gmra.mxu0 %vm512_vm2, %v4043_v49 }
  0xc5   : > { %3370 = vmatpush3.bf16.msra.mxu0 %v2350_v63  ;;  %3307 = vmatprep.mubr.msk.bf16.mxu0 %vm512_vm2, %v4067_v60 }
  0xc6   : > { %3270 = vmatmul.mubr.msk.bf16.vlgmr.msra.gmra.mxu1 %vm512_vm2, %v3988_v27 }
  0xc7   : > { %3336 = vmatpush3.bf16.msra.mxu1 %v2143_v35  ;;  %3273 = vmatprep.mubr.msk.bf16.mxu1 %vm512_vm2, %v4045_v15 }
  0xcc   : > { %3308 = vmatmul.mubr.msk.bf16.gmra.mxu0 %vm512_vm2, %v4095_v47 }
  0xcd   : > { %3311 = vmatprep.mubr.msk.bf16.mxu0 %vm512_vm2, %v4101_v50 }
  0xce   : > { %3274 = vmatmul.mubr.msk.bf16.gmra.mxu1 %vm512_vm2, %v4053_v20 }
  0xcf   : > { %3277 = vmatprep.mubr.msk.bf16.mxu1 %vm512_vm2, %v4085_v19 }
  0xd4   : > { %3312 = vmatmul.mubr.msk.bf16.gmra.mxu0 %vm512_vm2, %v4124_v0 }
  0xd5   : > { %3315 = vmatprep.mubr.msk.bf16.mxu0 %vm512_vm2, %v3986_v3 }
  0xd6   : > { %3278 = vmatmul.mubr.msk.bf16.gmra.mxu1 %vm512_vm2, %v4087_v16 }
  0xd7   : > { %3281 = vmatprep.mubr.msk.bf16.mxu1 %vm512_vm2, %v4115_v36 }
  0xdc   : > { %3316 = vmatmul.mubr.msk.bf16.gmra.mxu0 %vm512_vm2, %v3994_v51 }
  0xdd   : > { %3319 = vmatprep.mubr.msk.bf16.mxu0 %vm512_vm2, %v4001_v55 }
  0xde   : > { %3282 = vmatmul.mubr.msk.bf16.gmra.mxu1 %vm512_vm2, %v4117_v42 }
  0xdf   : > { %3285 = vmatprep.mubr.msk.bf16.mxu1 %vm512_vm2, %v4141_v39 }
  0xe4   : > { %v3101_v38 = vpop.f32.mrf.mxu0  ;;  %3320 = vmatmul.mubr.msk.bf16.gmra.mxu0 %vm512_vm2, %v4022_v32 }
  0xe5   : > { %3323 = vmatprep.mubr.msk.bf16.mxu0 %vm512_vm2, %v4035_v59 }
  0xe6   : > { %v4336_v3 = vpop.f32.mrf.mxu1  ;;  %3286 = vmatmul.mubr.msk.bf16.gmra.mxu1 %vm512_vm2, %v4143_v29  ;;  %v599_v51 = vpop.f32.mrf.mxu0 }
  0xe7   : > { %3289 = vmatprep.mubr.msk.bf16.mxu1 %vm512_vm2, %v4163_v22 }
  0xe8   : > { %v4342_v55 = vpop.f32.mrf.mxu1  ;;  %v3102_v44 = vpop.f32.mrf.mxu0 }
  0xea   : > { %v4344_v49 = vpop.f32.mrf.mxu1  ;;  %v602_v60 = vpop.f32.mrf.mxu0 }
  0xec   : > { %v4346_v47 = vpop.f32.mrf.mxu1  ;;  %v4348_v32 = vpop.f32.mrf.mxu0  ;;  %3324 = vmatmul.mubr.msk.bf16.gmra.mxu0 %vm512_vm2, %v4049_v52 }
  0xed   : > { %3327 = vmatprep.mubr.msk.bf16.mxu0 %vm512_vm2, %v4063_v46 }
  0xee   : > { %v4354_v59 = vpop.f32.mrf.mxu1  ;;  %3290 = vmatmul.mubr.msk.bf16.gmra.mxu1 %vm512_vm2, %v4165_v23  ;;  %v4358_v50 = vpop.f32.mrf.mxu0 }
  0xef   : > { %3293 = vmatprep.mubr.msk.bf16.mxu1 %vm512_vm2, %v4185_v41 }
  0xf0   : > { %v4362_v0 = vpop.f32.mrf.mxu1  ;;  %v4364_v6 = vpop.f32.mrf.mxu0 }
  0xf2   : > { %v4366_v10 = vpop.f32.mrf.mxu1  ;;  %v4368_v52 = vpop.f32.mrf.mxu0 }
  0xf4   : > { %v4370_v11 = vpop.f32.mrf.mxu1  ;;  %v4372_v46 = vpop.f32.mrf.mxu0  ;;  %3328 = vmatmul.mubr.msk.bf16.gmra.mxu0 %vm512_vm2, %v4071_v18  ;;  %v1928_v18 = vpack.c.bf16 %v4381_v57, %v4378_v7 }
  0xf5   : > { %3331 = vmatprep.mubr.msk.bf16.mxu0 %vm512_vm2, %v1311_v21 }
  0xf6   : > { %v4383_v58 = vpop.f32.mrf.mxu1  ;;  %3294 = vmatmul.mubr.msk.bf16.gmra.mxu1 %vm512_vm2, %v4187_v33  ;;  %v4387_v43 = vpop.f32.mrf.mxu0 }
  0xf7   : > { %5169 = vst [vmem:[#allocation5_spill] sm:$0xff] %v4383_v58  ;;  %3297 = vmatprep.mubr.msk.bf16.mxu1 %vm512_vm2, %v4204_v48 }
  0xf8   : > { %v4391_v40 = vpop.f32.mrf.mxu1  ;;  %v4393_v1 = vpop.f32.mrf.mxu0 }
  0xf9   : > { %5170 = vst [vmem:[#allocation6_spill] sm:$0xff] %v4391_v40 }
  0xfa   : > { %v4397_v31 = vpop.f32.mrf.mxu1  ;;  %v4399_v5 = vpop.f32.mrf.mxu0 }
  0xfb   : > { %5171 = vst [vmem:[#allocation8_spill] sm:$0xff] %v4397_v31 }
  0xfc   : > { %v4401_v54 = vpop.f32.mrf.mxu1  ;;  %v4403_v24 = vpop.f32.mrf.mxu0  ;;  %3332 = vmatmul.mubr.msk.bf16.gmra.mxu0 %vm512_vm2, %v1928_v18 }
  0xfd   : > { %5172 = vst [vmem:[#allocation11_spill] sm:$0xff] %v4401_v54  ;;  %3371 = vmatprep.mubr.msk.bf16.mxu0 %vm512_vm2, %v3988_v27 }
  0xfe   : > { %v4408_v34 = vpop.f32.mrf.mxu1  ;;  %3298 = vmatmul.mubr.msk.bf16.gmra.mxu1 %vm512_vm2, %v4211_v13  ;;  %v4412_v8 = vpop.f32.mrf.mxu0 }
  0xff   : > { %5173 = vst [vmem:[#allocation14_spill] sm:$0xff] %v4408_v34  ;;  %3337 = vmatprep.mubr.msk.bf16.mxu1 %vm512_vm2, %v5160_v9 }
 0x100   : > { %v4416_v4 = vpop.f32.mrf.mxu1  ;;  %v4418_v21 = vpop.f32.mrf.mxu0 }
 0x101   : > { %5174 = vst [vmem:[#allocation16_spill] sm:$0xff] %v4416_v4 }
 0x102   : > { %v4420_v63 = vpop.f32.mrf.mxu1  ;;  %v4422_v35 = vpop.f32.mrf.mxu0 }
 0x103   : > { %5175 = vst [vmem:[#allocation20_spill] sm:$0xff] %v4420_v63 }
 0x104   : > { %v4424_v18 = vpop.f32.mrf.mxu1  ;;  %v3169_v27 = vpop.f32.mrf.mxu0  ;;  %3372 = vmatmul.mubr.msk.bf16.vlgmr.msra.gmra.mxu0 %vm512_vm2, %v4045_v15 }
 0x105   : > { %5176 = vst [vmem:[#allocation9_spill] sm:$0xff] %v4424_v18  ;;  %3375 = vmatprep.mubr.msk.bf16.mxu0 %vm512_vm2, %v4053_v20 }
 0x106   : > { %v3135_v34 = vpop.f32.mrf.mxu1  ;;  %3338 = vmatmul.mubr.msk.bf16.vlgmr.msra.gmra.mxu1 %vm512_vm2, %v5161_v14  ;;  %v1152_v9 = vpop.f32.mrf.mxu0 }
 0x107   : > { %v820_v4 = vadd.f32 %v3135_v34, %v3101_v38  ;;  %3341 = vmatprep.mubr.msk.bf16.mxu1 %vm512_vm2, %v5162_v56 }
 0x108   : > { %v811_v63 = vpop.f32.mrf.mxu1  ;;  %v3170_v54 = vpop.f32.mrf.mxu0 }
 0x109   : > { %v4434_v31 = vadd.f32 %v3169_v27, %v820_v4  ;;  %v812_v18 = vadd.f32 %v811_v63, %v599_v51 }
 0x10a   : > { %v3136_v40 = vpop.f32.mrf.mxu1  ;;  %v1155_v45 = vpop.f32.mrf.mxu0 }
 0x10b   : > { %v4436_v15 = vadd.f32 %v1152_v9, %v812_v18  ;;  %v823_v58 = vadd.f32 %v3136_v40, %v3102_v44 }
 0x10c   : > { %v814_v20 = vpop.f32.mrf.mxu1  ;;  %v3173_v37 = vpop.f32.mrf.mxu0  ;;  %3376 = vmatmul.mubr.msk.bf16.gmra.mxu0 %vm512_vm2, %v4085_v19 }
 0x10d   : > { %v4440_v14 = vadd.f32 %v3170_v54, %v823_v58  ;;  %v815_v38 = vadd.f32 %v814_v20, %v602_v60  ;;  %3379 = vmatprep.mubr.msk.bf16.mxu0 %vm512_vm2, %v4087_v16 }
 0x10e   : > { %v3139_v56 = vpop.f32.mrf.mxu1  ;;  %3342 = vmatmul.mubr.msk.bf16.gmra.mxu1 %vm512_vm2, %v3910_v2  ;;  %v1168_v51 = vpop.f32.mrf.mxu0 }
 0x10f   : > { %v4446_v34 = vadd.f32 %v1155_v45, %v815_v38  ;;  %v836_v44 = vadd.f32 %v3139_v56, %v4348_v32  ;;  %3345 = vmatprep.mubr.msk.bf16.mxu1 %vm512_vm2, %v3931_v62 }
 0x110   : > { %v827_v40 = vpop.f32.mrf.mxu1  ;;  %v3174_v19 = vpop.f32.mrf.mxu0 }
 0x111   : > { %v4451_v58 = vadd.f32 %v3173_v37, %v836_v44  ;;  %v828_v60 = vadd.f32 %v827_v40, %v4358_v50 }
 0x112   : > { %v3140_v54 = vpop.f32.mrf.mxu1  ;;  %v1171_v16 = vpop.f32.mrf.mxu0 }
 0x113   : > { %v4454_v4 = vadd.f32 %v1168_v51, %v828_v60  ;;  %v839_v2 = vadd.f32 %v3140_v54, %v4364_v6 }
 0x114   : > { %v830_v63 = vpop.f32.mrf.mxu1  ;;  %v3177_v45 = vpop.f32.mrf.mxu0  ;;  %3380 = vmatmul.mubr.msk.bf16.gmra.mxu0 %vm512_vm2, %v4115_v36 }
 0x115   : > { %v4459_v32 = vadd.f32 %v3174_v19, %v839_v2  ;;  %v831_v62 = vadd.f32 %v830_v63, %v4368_v52  ;;  %3383 = vmatprep.mubr.msk.bf16.mxu0 %vm512_vm2, %v4117_v42 }
 0x116   : > { %v3143_v37 = vpop.f32.mrf.mxu1  ;;  %3346 = vmatmul.mubr.msk.bf16.gmra.mxu1 %vm512_vm2, %v3953_v28  ;;  %v1184_v50 = vpop.f32.mrf.mxu0 }
 0x117   : > { %v4466_v18 = vadd.f32 %v1171_v16, %v831_v62  ;;  %v852_v6 = vadd.f32 %v3143_v37, %v4372_v46  ;;  %3349 = vmatprep.mubr.msk.bf16.mxu1 %vm512_vm2, %v5163_v30 }
 0x118   : > { %v843_v36 = vpop.f32.mrf.mxu1  ;;  %v3178_v27 = vpop.f32.mrf.mxu0 }
 0x119   : > { %v4471_v9 = vadd.f32 %v3177_v45, %v852_v6  ;;  %v844_v52 = vadd.f32 %v843_v36, %v4387_v43 }
 0x11a   : > { %v3144_v20 = vpop.f32.mrf.mxu1  ;;  %v1187_v42 = vpop.f32.mrf.mxu0 }
 0x11b   : > { %v4474_v38 = vadd.f32 %v1184_v50, %v844_v52  ;;  %v855_v28 = vadd.f32 %v3144_v20, %v4393_v1 }
 0x11c   : > { %v846_v56 = vpop.f32.mrf.mxu1  ;;  %v3181_v51 = vpop.f32.mrf.mxu0  ;;  %3384 = vmatmul.mubr.msk.bf16.gmra.mxu0 %vm512_vm2, %v4141_v39 }
 0x11d   : > { %v4479_v46 = vadd.f32 %v3178_v27, %v855_v28  ;;  %v847_v30 = vadd.f32 %v846_v56, %v4399_v5  ;;  %3387 = vmatprep.mubr.msk.bf16.mxu0 %vm512_vm2, %v4143_v29 }
 0x11e   : > { %v3147_v44 = vpop.f32.mrf.mxu1  ;;  %3350 = vmatmul.mubr.msk.bf16.gmra.mxu1 %vm512_vm2, %v5164_v25  ;;  %v1200_v43 = vpop.f32.mrf.mxu0 }
 0x11f   : > { %v4486_v40 = vadd.f32 %v1187_v42, %v847_v30  ;;  %v868_v1 = vadd.f32 %v3147_v44, %v4403_v24  ;;  %3353 = vmatprep.mubr.msk.bf16.mxu1 %vm512_vm2, %v5165_v26  ;;  %v309_v42 = vld [vmem:[%s3653_s13 + $0x1a8] sm:$0x3]  ;;  %v2131_v44 = vrot.slane %v4378_v7, 1  ;;  %s2790_s13 = sshll.u32 %s237_s10, 8 }
 0x120   : > { %v859_v39 = vpop.f32.mrf.mxu1  ;;  %v3182_v19 = vpop.f32.mrf.mxu0  ;;  %s4841_s22 = scalar_lea.vmem [#allocation2], %s2790_s13 }
 0x121   : > { %v4491_v60 = vadd.f32 %v3181_v51, %v868_v1  ;;  %v860_v5 = vadd.f32 %v859_v39, %v4412_v8  ;;  %v2339_v51 = vrot.slane %v4381_v57, 2  ;;  %s2671_s26 = sshll.u32 %s4841_s22, 4  ;;  %s5044_s26 = int_to_ptr.vmem [resolvable:$true] %s2671_s26 }
 0x122   : > { %v3148_v54 = vpop.f32.mrf.mxu1  ;;  %v1203_v29 = vpop.f32.mrf.mxu0  ;;  %s3473_s6 = scalar_lea.vmem %s5044_s26, 4096  ;;  %p3480_p1 = scmp.lt.s32.totalorder %s5044_s26, %s3478_s8 }
 0x123   : > { %v4494_v16 = vadd.f32 %v1200_v43, %v860_v5  ;;  %v871_v25 = vadd.f32 %v3148_v54, %v4418_v21  ;;  %p3474_p12 = scmp.ne.s32.totalorder %s5044_s26, %s3473_s6  ;;  %p3481_p2 = scmp.lt.s32.totalorder %s3479_s9, %s3473_s6 }
 0x124   : > { %v862_v2 = vpop.f32.mrf.mxu1  ;;  %v3185_v63 = vpop.f32.mrf.mxu0  ;;  %3388 = vmatmul.mubr.msk.bf16.gmra.mxu0 %vm512_vm2, %v4163_v22 }
 0x125   : > { %v4499_v24 = vadd.f32 %v3182_v19, %v871_v25  ;;  %v863_v26 = vadd.f32 %v862_v2, %v4422_v35  ;;  %3391 = vmatprep.mubr.msk.bf16.mxu0 %vm512_vm2, %v4165_v23  ;;  %v2134_v19 = vrot.slane %v309_v42, 1  ;;  %v5177_v2 = vld [vmem:[#allocation22_spill] sm:$0xff]  ;;  %p3475_p13 = pnand %p3474_p12, %p3619_p4  ;;  %p3482_p3 = por %p3481_p2, %p3480_p1 }
 0x126   : > { %v3151_v45 = vpop.f32.mrf.mxu1  ;;  %3354 = vmatmul.mubr.msk.bf16.gmra.mxu1 %vm512_vm2, %v5166_v17  ;;  %v1216_v8 = vpop.f32.mrf.mxu0 }
 0x127   : > { %v4506_v62 = vadd.f32 %v1203_v29, %v863_v26  ;;  %v884_v21 = vadd.f32 %v3151_v45, %v4336_v3  ;;  %3357 = vmatprep.mubr.msk.bf16.mxu1 %vm512_vm2, %v5167_v53  ;;  %v5178_v26 = vld [vmem:[#allocation5_spill] sm:$0xff]  ;;  %p3476_p0 = pneg %p3475_p13 }
 0x128   : > { %v875_v22 = vpop.f32.mrf.mxu1  ;;  %v3186_v37 = vpop.f32.mrf.mxu0  ;;  %v5179_v45 = vld [vmem:[#allocation21_spill] sm:$0xff] }
 0x129   : > { %v4511_v50 = vadd.f32 %v3185_v63, %v884_v21  ;;  %v876_v35 = vadd.f32 %v875_v22, %v4342_v55  ;;  %p3483_p5 = pnand %p3482_p3, %p3476_p0 }
 0x12a   : > { %v3152_v23 = vpop.f32.mrf.mxu1  ;;  %v1219_v6 = vpop.f32.mrf.mxu0 }
 0x12b   : > { %v4514_v36 = vadd.f32 %v1216_v8, %v876_v35  ;;  %v887_v17 = vadd.f32 %v3152_v23, %v4344_v49  ;;  %v5180_v35 = vld [vmem:[#allocation6_spill] sm:$0xff] }
 0x12c   : > { %v878_v27 = vpop.f32.mrf.mxu1  ;;  %v3189_v52 = vpop.f32.mrf.mxu0  ;;  %3392 = vmatmul.mubr.msk.bf16.gmra.mxu0 %vm512_vm2, %v4185_v41  ;;  %v2338_v41 = vrot.slane %v4378_v7, 2 }
 0x12d   : > { %v4519_v3 = vadd.f32 %v3186_v37, %v887_v17  ;;  %v879_v53 = vadd.f32 %v878_v27, %v4346_v47  ;;  %3395 = vmatprep.mubr.msk.bf16.mxu0 %vm512_vm2, %v4187_v33 }
 0x12e   : > { %v3155_v20 = vpop.f32.mrf.mxu1  ;;  %3358 = vmatmul.mubr.msk.bf16.gmra.mxu1 %vm512_vm2, %v3929_v61  ;;  %v1232_v55 = vpop.f32.mrf.mxu0  ;;  %v2341_v61 = vrot.slane %v309_v42, 2  ;;  %v2340_v7 = vsel %vm938_vm3, %v2338_v41, %v2339_v51  ;;  %v5182_v41 = vld [vmem:[#allocation11_spill] sm:$0xff] }
 0x12f   : > { %v4527_v28 = vadd.f32 %v1219_v6, %v879_v53  ;;  %v900_v49 = vadd.f32 %v3155_v20, %v4354_v59  ;;  %3361 = vmatprep.mubr.msk.bf16.mxu1 %vm512_vm2, %v3934_v12  ;;  %v2132_v59 = vrot.slane %v4381_v57, 1  ;;  %v5181_v53 = vld [vmem:[#allocation8_spill] sm:$0xff] }
 0x130   : > { %v891_v56 = vpop.f32.mrf.mxu1  ;;  %v3190_v47 = vpop.f32.mrf.mxu0  ;;  %v2342_v57 = vsel %vm938_vm3, %v2339_v51, %v2341_v61  ;;  %v5183_v61 = vld [vmem:[#allocation14_spill] sm:$0xff] }
 0x131   : > { %v4534_v33 = vadd.f32 %v3189_v52, %v900_v49  ;;  %v892_v30 = vadd.f32 %v891_v56, %v4362_v0  ;;  %v2345_v22 = vpack.c.bf16 %v2342_v57, %v2340_v7  ;;  %v5185_v7 = vld [vmem:[#allocation20_spill] sm:$0xff] }
 0x132   : > { %v3156_v43 = vpop.f32.mrf.mxu1  ;;  %v1235_v1 = vpop.f32.mrf.mxu0 }
 0x133   : > { %v4539_v39 = vadd.f32 %v1232_v55, %v892_v30  ;;  %v903_v12 = vadd.f32 %v3156_v43, %v4366_v10 }
 0x134   : > { %v894_v5 = vpop.f32.mrf.mxu1  ;;  %v3193_v54 = vpop.f32.mrf.mxu0  ;;  %3396 = vmatmul.mubr.msk.bf16.gmra.mxu0 %vm512_vm2, %v4204_v48 }
 0x135   : > { %v4544_v29 = vadd.f32 %v3190_v47, %v903_v12  ;;  %v895_v0 = vadd.f32 %v894_v5, %v4370_v11  ;;  %3399 = vmatprep.mubr.msk.bf16.mxu0 %vm512_vm2, %v4211_v13  ;;  %v2133_v11 = vsel %vm383_vm1, %v2131_v44, %v2132_v59  ;;  %v2135_v13 = vsel %vm383_vm1, %v2132_v59, %v2134_v19  ;;  %v5184_v12 = vld [vmem:[#allocation16_spill] sm:$0xff] }
 0x136   : > { %v3159_v25 = vpop.f32.mrf.mxu1  ;;  %3362 = vmatmul.mubr.msk.bf16.gmra.mxu1 %vm512_vm2, %v5177_v2  ;;  %v1248_v10 = vpop.f32.mrf.mxu0  ;;  %v2138_v27 = vpack.c.bf16 %v2135_v13, %v2133_v11 }
 0x137   : > { %v4553_v63 = vadd.f32 %v1235_v1, %v895_v0  ;;  %v916_v48 = vadd.f32 %v3159_v25, %v5178_v26  ;;  %3365 = vmatprep.mubr.msk.bf16.mxu1 %vm512_vm2, %v5179_v45  ;;  %v5186_v26 = vld [vmem:[#allocation9_spill] sm:$0xff] }
 0x138   : > { %v907_v8 = vpop.f32.mrf.mxu1  ;;  %v3194_v21 = vpop.f32.mrf.mxu0 }
 0x139   : > { %v4560_v37 = vadd.f32 %v3193_v54, %v916_v48  ;;  %v908_v23 = vadd.f32 %v907_v8, %v5180_v35 }
 0x13a   : > { %v3160_v6 = vpop.f32.mrf.mxu1  ;;  %v1251_v17 = vpop.f32.mrf.mxu0 }
 0x13b   : > { %v4563_v52 = vadd.f32 %v1248_v10, %v908_v23  ;;  %v919_v20 = vadd.f32 %v3160_v6, %v5181_v53 }
 0x13c   : > { %v910_v55 = vpop.f32.mrf.mxu1  ;;  %v3197_v42 = vpop.f32.mrf.mxu0  ;;  %3400 = vmatmul.mubr.msk.bf16.gmra.mxu0 %vm512_vm2, %v2345_v22 }
 0x13d   : > { %v4567_v49 = vadd.f32 %v3194_v21, %v919_v20  ;;  %v911_v56 = vadd.f32 %v910_v55, %v5182_v41 }
 0x13e   : > { %v3163_v47 = vpop.f32.mrf.mxu1  ;;  %3366 = vmatmul.mubr.msk.bf16.gmra.mxu1 %vm512_vm2, %v2138_v27  ;;  %v1264_v51 = vpop.f32.mrf.mxu0 }
 0x13f   : > { %v4571_v30 = vadd.f32 %v1251_v17, %v911_v56  ;;  %v932_v44 = vadd.f32 %v3163_v47, %v5183_v61 }
 0x140   : > { %v923_v43 = vpop.f32.mrf.mxu1  ;;  %v3198_v1 = vpop.f32.mrf.mxu0 }
 0x141   : > { %v4574_v59 = vadd.f32 %v3197_v42, %v932_v44  ;;  %v924_v19 = vadd.f32 %v923_v43, %v5184_v12 }
 0x142   : > { %v3164_v5 = vpop.f32.mrf.mxu1  ;;  %v1267_v54 = vpop.f32.mrf.mxu0 }
 0x143   : > { %v4577_v0 = vadd.f32 %v1264_v51, %v924_v19  ;;  %v935_v57 = vadd.f32 %v3164_v5, %v5185_v7 }
 0x144   : > { %v926_v25 = vpop.f32.mrf.mxu1  ;;  %v3237_v2 = vpop.f32.mrf.mxu0 }
 0x145   : > { %v4580_v10 = vadd.f32 %v3198_v1, %v935_v57  ;;  %v927_v48 = vadd.f32 %v926_v25, %v5186_v26 }
 0x146   : > { %v3203_v45 = vpop.f32.mrf.mxu1  ;;  %v1562_v11 = vpop.f32.mrf.mxu0 }
 0x147   : > { %v4583_v13 = vadd.f32 %v1267_v54, %v927_v48  ;;  %v1481_v8 = vadd.f32 %v3203_v45, %v4434_v31 }
 0x148   : > { %v1352_v21 = vpop.f32.mrf.mxu1  ;;  %v3238_v22 = vpop.f32.mrf.mxu0 }
 0x149   : > { %v4586_v35 = vadd.f32 %v3237_v2, %v1481_v8  ;;  %v1479_v23 = vadd.f32 %v1352_v21, %v4436_v15 }
 0x14a   : > { %v3204_v6 = vpop.f32.mrf.mxu1  ;;  %v1565_v17 = vpop.f32.mrf.mxu0 }
 0x14b   : > { %v4589_v27 = vadd.f32 %v1562_v11, %v1479_v23  ;;  %v1482_v53 = vadd.f32 %v3204_v6, %v4440_v14 }
 0x14c   : > { %v1355_v20 = vpop.f32.mrf.mxu1  ;;  %v3241_v55 = vpop.f32.mrf.mxu0 }
 0x14d   : > { %v4592_v42 = vadd.f32 %v3238_v22, %v1482_v53  ;;  %v1480_v41 = vadd.f32 %v1355_v20, %v4446_v34 }
 0x14e   : > { %v3207_v56 = vpop.f32.mrf.mxu1  ;;  %v1578_v31 = vpop.f32.mrf.mxu0 }
 0x14f   : > { %v4595_v47 = vadd.f32 %v1565_v17, %v1480_v41  ;;  %v1485_v51 = vadd.f32 %v3207_v56, %v4451_v58 }
 0x150   : > { %v1368_v61 = vpop.f32.mrf.mxu1  ;;  %v3242_v15 = vpop.f32.mrf.mxu0 }
 0x151   : > { %v4598_v44 = vadd.f32 %v3241_v55, %v1485_v51  ;;  %v1483_v43 = vadd.f32 %v1368_v61, %v4454_v4 }
 0x152   : > { %v3208_v1 = vpop.f32.mrf.mxu1  ;;  %v1581_v14 = vpop.f32.mrf.mxu0 }
 0x153   : > { %v4601_v12 = vadd.f32 %v1578_v31, %v1483_v43  ;;  %v1486_v19 = vadd.f32 %v3208_v1, %v4459_v32 }
 0x154   : > { %v1371_v5 = vpop.f32.mrf.mxu1  ;;  %v3245_v34 = vpop.f32.mrf.mxu0 }
 0x155   : > { %v4604_v54 = vadd.f32 %v3242_v15, %v1486_v19  ;;  %v1484_v7 = vadd.f32 %v1371_v5, %v4466_v18 }
 0x156   : > { %v3211_v57 = vpop.f32.mrf.mxu1  ;;  %v1594_v58 = vpop.f32.mrf.mxu0 }
 0x157   : > { %v4607_v25 = vadd.f32 %v1581_v14, %v1484_v7  ;;  %v1489_v2 = vadd.f32 %v3211_v57, %v4471_v9 }
 0x158   : > { %v1384_v26 = vpop.f32.mrf.mxu1  ;;  %v3246_v4 = vpop.f32.mrf.mxu0 }
 0x159   : > { %v4610_v48 = vadd.f32 %v3245_v34, %v1489_v2  ;;  %v1487_v45 = vadd.f32 %v1384_v26, %v4474_v38 }
 0x15a   : > { %v3212_v11 = vpop.f32.mrf.mxu1  ;;  %v1597_v32 = vpop.f32.mrf.mxu0 }
 0x15b   : > { %v4613_v8 = vadd.f32 %v1594_v58, %v1487_v45  ;;  %v1490_v21 = vadd.f32 %v3212_v11, %v4479_v46 }
 0x15c   : > { %v1387_v22 = vpop.f32.mrf.mxu1  ;;  %v3249_v18 = vpop.f32.mrf.mxu0 }
 0x15d   : > { %v4616_v23 = vadd.f32 %v3246_v4, %v1490_v21  ;;  %v1488_v6 = vadd.f32 %v1387_v22, %v4486_v40 }
 0x15e   : > { %v3215_v17 = vpop.f32.mrf.mxu1  ;;  %v1610_v9 = vpop.f32.mrf.mxu0 }
 0x15f   : > { %v4619_v53 = vadd.f32 %v1597_v32, %v1488_v6  ;;  %v1493_v20 = vadd.f32 %v3215_v17, %v4491_v60 }
 0x160   : > { %v1400_v55 = vpop.f32.mrf.mxu1  ;;  %v3250_v38 = vpop.f32.mrf.mxu0 }
 0x161   : > { %v4622_v41 = vadd.f32 %v3249_v18, %v1493_v20  ;;  %v1491_v56 = vadd.f32 %v1400_v55, %v4494_v16 }
 0x162   : > { %v3216_v31 = vpop.f32.mrf.mxu1  ;;  %v1613_v46 = vpop.f32.mrf.mxu0 }
 0x163   : > { %v4625_v51 = vadd.f32 %v1610_v9, %v1491_v56  ;;  %v1494_v61 = vadd.f32 %v3216_v31, %v4499_v24 }
 0x164   : > { %v1403_v15 = vpop.f32.mrf.mxu1  ;;  %v3253_v40 = vpop.f32.mrf.mxu0 }
 0x165   : > { %v4628_v43 = vadd.f32 %v3250_v38, %v1494_v61  ;;  %v1492_v1 = vadd.f32 %v1403_v15, %v4506_v62 }
 0x166   : > { %v3219_v14 = vpop.f32.mrf.mxu1  ;;  %v1626_v60 = vpop.f32.mrf.mxu0 }
 0x167   : > { %v4631_v19 = vadd.f32 %v1613_v46, %v1492_v1  ;;  %v1497_v5 = vadd.f32 %v3219_v14, %v4511_v50 }
 0x168   : > { %v1416_v34 = vpop.f32.mrf.mxu1  ;;  %v3254_v16 = vpop.f32.mrf.mxu0 }
 0x169   : > { %v4634_v7 = vadd.f32 %v3253_v40, %v1497_v5  ;;  %v1495_v57 = vadd.f32 %v1416_v34, %v4514_v36 }
 0x16a   : > { %v3220_v58 = vpop.f32.mrf.mxu1  ;;  %v1629_v24 = vpop.f32.mrf.mxu0 }
 0x16b   : > { %v4637_v2 = vadd.f32 %v1626_v60, %v1495_v57  ;;  %v1498_v26 = vadd.f32 %v3220_v58, %v4519_v3 }
 0x16c   : > { %v1419_v4 = vpop.f32.mrf.mxu1  ;;  %v3257_v62 = vpop.f32.mrf.mxu0 }
 0x16d   : > { %v4640_v45 = vadd.f32 %v3254_v16, %v1498_v26  ;;  %v1496_v11 = vadd.f32 %v1419_v4, %v4527_v28 }
 0x16e   : > { %v3223_v32 = vpop.f32.mrf.mxu1  ;;  %v1642_v50 = vpop.f32.mrf.mxu0 }
 0x16f   : > { %5187 = vst [vmem:[#allocation12_spill] sm:$0xff] %v4640_v45  ;;  %v4643_v21 = vadd.f32 %v1629_v24, %v1496_v11  ;;  %v1501_v22 = vadd.f32 %v3223_v32, %v4534_v33 }
 0x170   : > { %v1432_v18 = vpop.f32.mrf.mxu1  ;;  %v3258_v36 = vpop.f32.mrf.mxu0 }
 0x171   : > { %5188 = vst [vmem:[#allocation15_spill] sm:$0xff] %v4643_v21  ;;  %v4646_v6 = vadd.f32 %v3257_v62, %v1501_v22  ;;  %v1499_v17 = vadd.f32 %v1432_v18, %v4539_v39 }
 0x172   : > { %v3224_v9 = vpop.f32.mrf.mxu1  ;;  %v1645_v3 = vpop.f32.mrf.mxu0 }
 0x173   : > { %5189 = vst [vmem:[#allocation18_spill] sm:$0xff] %v4646_v6  ;;  %v4649_v20 = vadd.f32 %v1642_v50, %v1499_v17  ;;  %v1502_v55 = vadd.f32 %v3224_v9, %v4544_v29 }
 0x174   : > { %v1435_v38 = vpop.f32.mrf.mxu1  ;;  %v3261_v28 = vpop.f32.mrf.mxu0 }
 0x175   : > { %5190 = vst [vmem:[#allocation7_spill] sm:$0xff] %v4649_v20  ;;  %v4652_v56 = vadd.f32 %v3258_v36, %v1502_v55  ;;  %v1500_v31 = vadd.f32 %v1435_v38, %v4553_v63 }
 0x176   : > { %v3227_v46 = vpop.f32.mrf.mxu1  ;;  %v1658_v33 = vpop.f32.mrf.mxu0 }
 0x177   : > { %5191 = vst [vmem:[#allocation10_spill] sm:$0xff] %v4652_v56  ;;  %v4655_v61 = vadd.f32 %v1645_v3, %v1500_v31  ;;  %v1505_v15 = vadd.f32 %v3227_v46, %v4560_v37 }
 0x178   : > { %v1448_v40 = vpop.f32.mrf.mxu1  ;;  %v3262_v39 = vpop.f32.mrf.mxu0 }
 0x179   : > { %5192 = vst [vmem:[#allocation13_spill] sm:$0xff] %v4655_v61  ;;  %v4658_v1 = vadd.f32 %v3261_v28, %v1505_v15  ;;  %v1503_v14 = vadd.f32 %v1448_v40, %v4563_v52 }
 0x17a   : > { %v3228_v60 = vpop.f32.mrf.mxu1  ;;  %v1661_v29 = vpop.f32.mrf.mxu0 }
 0x17b   : > { %5193 = vst [vmem:[#allocation17_spill] sm:$0xff] %v4658_v1  ;;  %v4661_v5 = vadd.f32 %v1658_v33, %v1503_v14  ;;  %v1506_v34 = vadd.f32 %v3228_v60, %v4567_v49 }
 0x17c   : > { %v1451_v16 = vpop.f32.mrf.mxu1  ;;  %v3265_v63 = vpop.f32.mrf.mxu0 }
 0x17d   : > { %5194 = vst [vmem:[#allocation19_spill] sm:$0xff] %v4661_v5  ;;  %v4664_v57 = vadd.f32 %v3262_v39, %v1506_v34  ;;  %v1504_v58 = vadd.f32 %v1451_v16, %v4571_v30 }
 0x17e   : > { %v3231_v24 = vpop.f32.mrf.mxu1  ;;  %v1674_v37 = vpop.f32.mrf.mxu0 }
 0x17f   : > { %5195 = vst [vmem:[#allocation22_spill] sm:$0xff] %v4664_v57  ;;  %v4667_v26 = vadd.f32 %v1661_v29, %v1504_v58  ;;  %v1509_v4 = vadd.f32 %v3231_v24, %v4574_v59 }
 0x180   : > { %v1464_v62 = vpop.f32.mrf.mxu1  ;;  %v3266_v52 = vpop.f32.mrf.mxu0 }
 0x181   : > { %5196 = vst [vmem:[#allocation5_spill] sm:$0xff] %v4667_v26  ;;  %v4670_v11 = vadd.f32 %v3265_v63, %v1509_v4  ;;  %v1507_v32 = vadd.f32 %v1464_v62, %v4577_v0 }
 0x182   : > { %v3232_v50 = vpop.f32.mrf.mxu1  ;;  %v1677_v49 = vpop.f32.mrf.mxu0 }
 0x183   : > { %5197 = vst [vmem:[#allocation21_spill] sm:$0xff] %v4670_v11  ;;  %v4673_v22 = vadd.f32 %v1674_v37, %v1507_v32  ;;  %v1510_v18 = vadd.f32 %v3232_v50, %v4580_v10 }
 0x184   : > { %v1467_v36 = vpop.f32.mrf.mxu1  ;;  %v4676_v30 = vpop.f32.mrf.mxu0 }
 0x185   : > { %5198 = vst [vmem:[#allocation6_spill] sm:$0xff] %v4673_v22  ;;  %v4678_v17 = vadd.f32 %v3266_v52, %v1510_v18  ;;  %v1508_v9 = vadd.f32 %v1467_v36, %v4583_v13 }
 0x186   : > { %v3271_v59 = vpop.f32.mrf.mxu1  ;;  %v4681_v3 = vpop.f32.mrf.mxu0 }
 0x187   : > { %5199 = vst [vmem:[#allocation8_spill] sm:$0xff] %v4678_v17  ;;  %v4683_v55 = vadd.f32 %v1677_v49, %v1508_v9 }
 0x188   : > { %v1769_v38 = vpop.f32.mrf.mxu1  ;;  %v4685_v0 = vpop.f32.mrf.mxu0 }
 0x189   : > { %5200 = vst [vmem:[#allocation11_spill] sm:$0xff] %v4683_v55 }
 0x18a   : > { %v4687_v28 = vpop.f32.mrf.mxu1  ;;  %v4689_v31 = vpop.f32.mrf.mxu0 }
 0x18c   : > { %v4691_v10 = vpop.f32.mrf.mxu1  ;;  %v4693_v46 = vpop.f32.mrf.mxu0 }
 0x18e   : > { %v4695_v33 = vpop.f32.mrf.mxu1  ;;  %v4697_v15 = vpop.f32.mrf.mxu0 }
 0x190   : > { %v4699_v13 = vpop.f32.mrf.mxu1  ;;  %v4701_v40 = vpop.f32.mrf.mxu0 }
 0x192   : > { %v4703_v39 = vpop.f32.mrf.mxu1  ;;  %v4705_v14 = vpop.f32.mrf.mxu0 }
 0x194   : > { %v4707_v60 = vpop.f32.mrf.mxu1  ;;  %v4709_v29 = vpop.f32.mrf.mxu0 }
 0x196   : > { %v4711_v34 = vpop.f32.mrf.mxu1  ;;  %v4713_v16 = vpop.f32.mrf.mxu0 }
 0x198   : > { %v4715_v63 = vpop.f32.mrf.mxu1  ;;  %v4717_v58 = vpop.f32.mrf.mxu0 }
 0x19a   : > { %v4719_v24 = vpop.f32.mrf.mxu1  ;;  %v4721_v37 = vpop.f32.mrf.mxu0 }
 0x19c   : > { %v4723_v4 = vpop.f32.mrf.mxu1  ;;  %v4725_v62 = vpop.f32.mrf.mxu0 }
 0x19e   : > { %v4727_v52 = vpop.f32.mrf.mxu1  ;;  %v4729_v32 = vpop.f32.mrf.mxu0 }
 0x1a0   : > { %v4731_v50 = vpop.f32.mrf.mxu1  ;;  %v4733_v49 = vpop.f32.mrf.mxu0 }
 0x1a2   : > { %v4735_v18 = vpop.f32.mrf.mxu1  ;;  %v4737_v36 = vpop.f32.mrf.mxu0 }
 0x1a4   : > { %v4739_v9 = vpop.f32.mrf.mxu1  ;;  %v4741_v55 = vpop.f32.mrf.mxu0 }
 0x1a6   : > { %v4743_v17 = vpop.f32.mrf.mxu1  ;;  %v4745_v22 = vpop.f32.mrf.mxu0 }
 0x1a7   : > { %5201 = vst [vmem:[#allocation14_spill] sm:$0xff] %v4745_v22 }
 0x1a8   : > { %v4747_v11 = vpop.f32.mrf.mxu1  ;;  %v4749_v26 = vpop.f32.mrf.mxu0 }
 0x1a9   : > { %5202 = vst [vmem:[#allocation16_spill] sm:$0xff] %v4749_v26 }
 0x1aa   : > { %v4751_v57 = vpop.f32.mrf.mxu1  ;;  %v4753_v5 = vpop.f32.mrf.mxu0 }
 0x1ab   : > { %5203 = vst [vmem:[#allocation20_spill] sm:$0xff] %v4751_v57  ;;  %5204 = vst [vmem:[#allocation9_spill] sm:$0xff] %v4753_v5 }
 0x1ac   : > { %v4755_v1 = vpop.f32.mrf.mxu1  ;;  %v4757_v61 = vpop.f32.mrf.mxu0 }
 0x1ad   : > { %5205 = vst [vmem:[#allocation23_spill] sm:$0xff] %v4755_v1  ;;  %5206 = vst [vmem:[#allocation24_spill] sm:$0xff] %v4757_v61 }
 0x1ae   : > { %v4759_v56 = vpop.f32.mrf.mxu1  ;;  %v4761_v20 = vpop.f32.mrf.mxu0 }
 0x1af   : > { %5207 = vst [vmem:[#allocation25_spill] sm:$0xff] %v4759_v56  ;;  %5208 = vst [vmem:[#allocation26_spill] sm:$0xff] %v4761_v20 }
 0x1b0   : > { %v4763_v6 = vpop.f32.mrf.mxu1  ;;  %v4765_v21 = vpop.f32.mrf.mxu0 }
 0x1b1   : > { %5209 = vst [vmem:[#allocation27_spill] sm:$0xff] %v4763_v6  ;;  %5210 = vst [vmem:[#allocation28_spill] sm:$0xff] %v4765_v21 }
 0x1b2   : > { %v4767_v22 = vpop.f32.mrf.mxu1  ;;  %v4769_v45 = vpop.f32.mrf.mxu0 }
 0x1b3   : > { %5211 = vst [vmem:[#allocation29_spill] sm:$0xff] %v4769_v45 }
 0x1b4   : > { %v4771_v26 = vpop.f32.mrf.mxu1  ;;  %v4773_v57 = vpop.f32.mrf.mxu0 }
 0x1b5   : > { %5212 = vst [vmem:[#allocation30_spill] sm:$0xff] %v4771_v26  ;;  %5213 = vst [vmem:[#allocation31_spill] sm:$0xff] %v4773_v57 }
 0x1b6   : > { %v4775_v5 = vpop.f32.mrf.mxu1  ;;  %v4777_v1 = vpop.f32.mrf.mxu0 }
 0x1b7   : > { %5214 = vst [vmem:[#allocation32_spill] sm:$0xff] %v4775_v5  ;;  %5215 = vst [vmem:[#allocation33_spill] sm:$0xff] %v4777_v1 }
 0x1b8   : > { %v4779_v61 = vpop.f32.mrf.mxu1  ;;  %v4781_v56 = vpop.f32.mrf.mxu0 }
 0x1b9   : > { %5216 = vst [vmem:[#allocation34_spill] sm:$0xff] %v4779_v61  ;;  %5217 = vst [vmem:[#allocation35_spill] sm:$0xff] %v4781_v56  ;;  %v1898_v61 = vadd.f32 %v3271_v59, %v4586_v35  ;;  %v1897_v59 = vadd.f32 %v4691_v10, %v4595_v47  ;;  %v1900_v47 = vadd.f32 %v4699_v13, %v4601_v12 }
 0x1ba   : > { %v4783_v20 = vpop.f32.mrf.mxu1  ;;  %v4785_v6 = vpop.f32.mrf.mxu0 }
 0x1bb   : > { %5218 = vst [vmem:[#allocation36_spill] sm:$0xff] %v4783_v20  ;;  %5219 = vst [vmem:[#allocation37_spill] sm:$0xff] %v4785_v6  ;;  %v1896_v6 = vadd.f32 %v1769_v38, %v4589_v27  ;;  %v1902_v27 = vadd.f32 %v4695_v33, %v4598_v44  ;;  %v4819_v38 = vld [vmem:[%s5100_s2] ss:$0 sm:$0xff] }
 0x1bc   : > { %v4787_v21 = vpop.f32.mrf.mxu1  ;;  %v4789_v45 = vpop.f32.mrf.mxu0  ;;  %v4829_v44 = vld [vmem:[%s5101_s3] ss:$0 sm:$0xff] }
 0x1bd   : > { %5220 = vst [vmem:[#allocation38_spill] sm:$0xff] %v4787_v21  ;;  %5221 = vst [vmem:[#allocation39_spill] sm:$0xff] %v4789_v45  ;;  %v2096_v35 = vadd.f32 %v4681_v3, %v1896_v6  ;;  %v2097_v3 = vadd.f32 %v4689_v31, %v1897_v59  ;;  %v2100_v31 = vadd.f32 %v4697_v15, %v1900_v47 }
 0x1be   : > { %v4791_v26 = vpop.f32.mrf.mxu1  ;;  %v4793_v57 = vpop.f32.mrf.mxu0 }
 0x1bf   : > { %5222 = vst [vmem:[#allocation40_spill] sm:$0xff] %v4791_v26  ;;  %5223 = vst [vmem:[#allocation41_spill] sm:$0xff] %v4793_v57  ;;  %v2098_v26 = vadd.f32 %v4676_v30, %v1898_v61  ;;  %v1899_v57 = vadd.f32 %v4687_v28, %v4592_v42 }
 0x1c0   : > { %v4795_v5 = vpop.f32.mrf.mxu1  ;;  %v4797_v1 = vpop.f32.mrf.mxu0 }
 0x1c1   : > { %5224 = vst [vmem:[#allocation42_spill] sm:$0xff] %v4795_v5  ;;  %5225 = vst [vmem:[#allocation43_spill] sm:$0xff] %v4797_v1  ;;  %v2099_v42 = vadd.f32 %v4685_v0, %v1899_v57  ;;  %v2102_v0 = vadd.f32 %v4693_v46, %v1902_v27 }
 0x1c2   : > { %v4800_v56 = vpop.f32.mrf.mxu1  ;;  %v4802_v20 = vpop.f32.mrf.mxu0 }
 0x1c3   : > { %5226 = vst [vmem:[#allocation44_spill] sm:$0xff] %v4802_v20 }
 0x1c4   : > { %v4805_v21 = vpop.f32.mrf.mxu1  ;;  %v3373_v45 = vpop.f32.mrf.mxu0 }
 0x1c5   : > { %5227 = vst [vmem:[#allocation45_spill] sm:$0xff] %v4805_v21 }
 0x1c6   : > { %v3339_v5 = vpop.f32.mrf.mxu1  ;;  %v2386_v1 = vpop.f32.mrf.mxu0 }
 0x1c7   : > { %v2308_v20 = vadd.f32 %v3339_v5, %v2098_v26 }
 0x1c8   : > { %v2179_v61 = vpop.f32.mrf.mxu1  ;;  %v3374_v30 = vpop.f32.mrf.mxu0 }
 0x1c9   : > { %v2515_v28 = vadd.f32 %v3373_v45, %v2308_v20  ;;  %v2306_v6 = vadd.f32 %v2179_v61, %v2096_v35  ;;  %v1903_v45 = vadd.f32 %v4703_v39, %v4604_v54 }
 0x1ca   : > { %v3340_v5 = vpop.f32.mrf.mxu1  ;;  %v2389_v26 = vpop.f32.mrf.mxu0 }
 0x1cb   : > { %v2554_v10 = vmul.f32 %v4819_v38, %v2515_v28  ;;  %v2513_v33 = vadd.f32 %v2386_v1, %v2306_v6  ;;  %v2309_v57 = vadd.f32 %v3340_v5, %v2099_v42  ;;  %v1901_v1 = vadd.f32 %v4707_v60, %v4607_v25 }
 0x1cc   : > { %v2182_v12 = vpop.f32.mrf.mxu1  ;;  %v3377_v20 = vpop.f32.mrf.mxu0  ;;  %v2103_v15 = vadd.f32 %v4701_v40, %v1903_v45  ;;  %v1906_v25 = vadd.f32 %v4711_v34, %v4610_v48 }
 0x1cd   : > { %v2593_v13 = vadd.f32 %v4829_v44, %v2554_v10  ;;  %v2552_v35 = vmul.f32 %v4819_v38, %v2513_v33  ;;  %v2516_v61 = vadd.f32 %v3374_v30, %v2309_v57  ;;  %v2307_v21 = vadd.f32 %v2182_v12, %v2097_v3 }
 0x1ce   : > { %v3343_v59 = vpop.f32.mrf.mxu1  ;;  %v2402_v42 = vpop.f32.mrf.mxu0  ;;  %v2101_v3 = vadd.f32 %v4705_v14, %v1901_v1  ;;  %v2106_v57 = vadd.f32 %v4709_v29, %v1906_v25 }
 0x1cf   : > { %2626 = vst.msk [vmem:[%s4841_s22 + $0x10] sm:$0xff] %vm2623_vm4, %v2593_v13  ;;  %v2591_v54 = vadd.f32 %v4829_v44, %v2552_v35  ;;  %v2555_v46 = vmul.f32 %v4819_v38, %v2516_v61  ;;  %v2514_v39 = vadd.f32 %v2389_v26, %v2307_v21  ;;  %v2312_v27 = vadd.f32 %v3343_v59, %v2102_v0 }
 0x1d0   : > { %v2195_v60 = vpop.f32.mrf.mxu1  ;;  %v3378_v30 = vpop.f32.mrf.mxu0  ;;  %v1904_v21 = vadd.f32 %v4715_v63, %v4613_v8  ;;  %v1907_v0 = vadd.f32 %v4719_v24, %v4616_v23  ;;  %v1905_v35 = vadd.f32 %v4723_v4, %v4619_v53 }
 0x1d1   : > { %2624 = vst.msk [vmem:[%s4841_s22] sm:$0xff] %vm2623_vm4, %v2591_v54  ;;  %v2594_v28 = vadd.f32 %v4829_v44, %v2555_v46  ;;  %v2553_v6 = vmul.f32 %v4819_v38, %v2514_v39  ;;  %v2519_v47 = vadd.f32 %v3377_v20, %v2312_v27  ;;  %v2310_v5 = vadd.f32 %v2195_v60, %v2100_v31 }
 0x1d2   : > { %v3344_v40 = vpop.f32.mrf.mxu1  ;;  %v2405_v26 = vpop.f32.mrf.mxu0  ;;  %v2104_v13 = vadd.f32 %v4713_v16, %v1904_v21  ;;  %v2107_v59 = vadd.f32 %v4717_v58, %v1907_v0  ;;  %v2105_v27 = vadd.f32 %v4721_v37, %v1905_v35  ;;  %v5228_v35 = vld [vmem:[#allocation12_spill] sm:$0xff] }
 0x1d3   : > { %2627 = vst.msk [vmem:[%s4841_s22 + $0x18] sm:$0xff] %vm2623_vm4, %v2594_v28  ;;  %v2592_v48 = vadd.f32 %v4829_v44, %v2553_v6  ;;  %v2558_v34 = vmul.f32 %v4819_v38, %v2519_v47  ;;  %v2517_v10 = vadd.f32 %v2402_v42, %v2310_v5  ;;  %v2313_v33 = vadd.f32 %v3344_v40, %v2103_v15 }
 0x1d4   : > { %v2198_v14 = vpop.f32.mrf.mxu1  ;;  %v3381_v45 = vpop.f32.mrf.mxu0  ;;  %v1910_v42 = vadd.f32 %v4727_v52, %v4622_v41  ;;  %v1908_v15 = vadd.f32 %v4731_v50, %v4625_v51  ;;  %v1911_v6 = vadd.f32 %v4735_v18, %v4628_v43  ;;  %v1909_v40 = vadd.f32 %v4739_v9, %v4631_v19 }
 0x1d5   : > { %2625 = vst.msk [vmem:[%s4841_s22 + $0x8] sm:$0xff] %vm2623_vm4, %v2592_v48  ;;  %v2597_v8 = vadd.f32 %v4829_v44, %v2558_v34  ;;  %v2556_v63 = vmul.f32 %v4819_v38, %v2517_v10  ;;  %v2520_v12 = vadd.f32 %v3378_v30, %v2313_v33  ;;  %v2311_v20 = vadd.f32 %v2198_v14, %v2101_v3 }
 0x1d6   : > { %v3347_v29 = vpop.f32.mrf.mxu1  ;;  %v2418_v61 = vpop.f32.mrf.mxu0  ;;  %v2110_v28 = vadd.f32 %v4725_v62, %v1910_v42  ;;  %v2108_v21 = vadd.f32 %v4729_v32, %v1908_v15  ;;  %v2111_v10 = vadd.f32 %v4733_v49, %v1911_v6  ;;  %v1914_v33 = vadd.f32 %v4743_v17, %v4634_v7  ;;  %v5231_v42 = vld [vmem:[#allocation15_spill] sm:$0xff]  ;;  %v5233_v15 = vld [vmem:[#allocation16_spill] sm:$0xff] }
 0x1d7   : > { %2630 = vst.msk [vmem:[%s4841_s22 + $0x30] sm:$0xff] %vm2623_vm4, %v2597_v8  ;;  %v2595_v23 = vadd.f32 %v4829_v44, %v2556_v63  ;;  %v2559_v24 = vmul.f32 %v4819_v38, %v2520_v12  ;;  %v2518_v31 = vadd.f32 %v2405_v26, %v2311_v20  ;;  %v2316_v1 = vadd.f32 %v3347_v29, %v2106_v57  ;;  %v5229_v29 = vld [vmem:[#allocation20_spill] sm:$0xff] }
 0x1d8   : > { %v2211_v16 = vpop.f32.mrf.mxu1  ;;  %v3382_v54 = vpop.f32.mrf.mxu0  ;;  %v1912_v8 = vadd.f32 %v4747_v11, %v4637_v2 }
 0x1d9   : > { %2628 = vst.msk [vmem:[%s4841_s22 + $0x20] sm:$0xff] %vm2623_vm4, %v2595_v23  ;;  %v2598_v53 = vadd.f32 %v4829_v44, %v2559_v24  ;;  %v2557_v4 = vmul.f32 %v4819_v38, %v2518_v31  ;;  %v2523_v46 = vadd.f32 %v3381_v45, %v2316_v1  ;;  %v2314_v39 = vadd.f32 %v2211_v16, %v2104_v13  ;;  %v5230_v1 = vld [vmem:[#allocation14_spill] sm:$0xff]  ;;  %v5232_v16 = vld [vmem:[#allocation23_spill] sm:$0xff] }
 0x1da   : > { %v3348_v58 = vpop.f32.mrf.mxu1  ;;  %v2421_v25 = vpop.f32.mrf.mxu0  ;;  %v2109_v45 = vadd.f32 %v4737_v36, %v1909_v40  ;;  %v2114_v13 = vadd.f32 %v4741_v55, %v1914_v33  ;;  %v5240_v33 = vld [vmem:[#allocation10_spill] sm:$0xff] }
 0x1db   : > { %2631 = vst.msk [vmem:[%s4841_s22 + $0x38] sm:$0xff] %vm2623_vm4, %v2598_v53  ;;  %v2596_v41 = vadd.f32 %v4829_v44, %v2557_v4  ;;  %v2562_v52 = vmul.f32 %v4819_v38, %v2523_v46  ;;  %v2521_v60 = vadd.f32 %v2418_v61, %v2314_v39  ;;  %v2317_v30 = vadd.f32 %v3348_v58, %v2107_v59 }
 0x1dc   : > { %v2214_v37 = vpop.f32.mrf.mxu1  ;;  %v3385_v47 = vpop.f32.mrf.mxu0  ;;  %v1915_v61 = vadd.f32 %v5229_v29, %v5228_v35  ;;  %v2112_v59 = vadd.f32 %v5230_v1, %v1912_v8  ;;  %v5241_v8 = vld [vmem:[#allocation26_spill] sm:$0xff] }
 0x1dd   : > { %2629 = vst.msk [vmem:[%s4841_s22 + $0x28] sm:$0xff] %vm2623_vm4, %v2596_v41  ;;  %v2601_v51 = vadd.f32 %v4829_v44, %v2562_v52  ;;  %v2560_v50 = vmul.f32 %v4819_v38, %v2521_v60  ;;  %v2524_v5 = vadd.f32 %v3382_v54, %v2317_v30  ;;  %v2315_v3 = vadd.f32 %v2214_v37, %v2105_v27  ;;  %v5235_v41 = vld [vmem:[#allocation25_spill] sm:$0xff] }
 0x1de   : > { %v3351_v62 = vpop.f32.mrf.mxu1  ;;  %v2434_v26 = vpop.f32.mrf.mxu0  ;;  %v1913_v54 = vadd.f32 %v5232_v16, %v5231_v42  ;;  %v2115_v58 = vadd.f32 %v5233_v15, %v1915_v61  ;;  %v5244_v61 = vld [vmem:[#allocation28_spill] sm:$0xff] }
 0x1df   : > { %2634 = vst.msk [vmem:[%s4841_s22 + $0x50] sm:$0xff] %vm2623_vm4, %v2601_v51  ;;  %v2599_v43 = vadd.f32 %v4829_v44, %v2560_v50  ;;  %v2563_v18 = vmul.f32 %v4819_v38, %v2524_v5  ;;  %v2522_v48 = vadd.f32 %v2421_v25, %v2315_v3  ;;  %v2320_v34 = vadd.f32 %v3351_v62, %v2110_v28  ;;  %v5234_v25 = vld [vmem:[#allocation18_spill] sm:$0xff]  ;;  %v5236_v51 = vld [vmem:[#allocation9_spill] sm:$0xff]  ;;  %v5237_v5 = vld [vmem:[#allocation7_spill] sm:$0xff] }
 0x1e0   : > { %v2227_v32 = vpop.f32.mrf.mxu1  ;;  %v3386_v57 = vpop.f32.mrf.mxu0  ;;  %v1918_v52 = vadd.f32 %v5235_v41, %v5234_v25  ;;  %v2113_v50 = vadd.f32 %v5236_v51, %v1913_v54  ;;  %v5238_v3 = vld [vmem:[#allocation27_spill] sm:$0xff]  ;;  %v5247_v54 = vld [vmem:[#allocation29_spill] sm:$0xff] }
 0x1e1   : > { %2632 = vst.msk [vmem:[%s4841_s22 + $0x40] sm:$0xff] %vm2623_vm4, %v2599_v43  ;;  %v2602_v19 = vadd.f32 %v4829_v44, %v2563_v18  ;;  %v2561_v9 = vmul.f32 %v4819_v38, %v2522_v48  ;;  %v2527_v0 = vadd.f32 %v3385_v47, %v2320_v34  ;;  %v2318_v14 = vadd.f32 %v2227_v32, %v2108_v21  ;;  %v5239_v34 = vld [vmem:[#allocation24_spill] sm:$0xff] }
 0x1e2   : > { %v3352_v49 = vpop.f32.mrf.mxu1  ;;  %v2437_v63 = vpop.f32.mrf.mxu0  ;;  %v1916_v21 = vadd.f32 %v5238_v3, %v5237_v5  ;;  %v1919_v32 = vadd.f32 %v4767_v22, %v5240_v33 }
 0x1e3   : > { %2635 = vst.msk [vmem:[%s4841_s22 + $0x58] sm:$0xff] %vm2623_vm4, %v2602_v19  ;;  %v2600_v7 = vadd.f32 %v4829_v44, %v2561_v9  ;;  %v2566_v17 = vmul.f32 %v4819_v38, %v2527_v0  ;;  %v2525_v12 = vadd.f32 %v2434_v26, %v2318_v14  ;;  %v2321_v20 = vadd.f32 %v3352_v49, %v2111_v10 }
 0x1e4   : > { %v2230_v36 = vpop.f32.mrf.mxu1  ;;  %v3389_v23 = vpop.f32.mrf.mxu0  ;;  %v2118_v10 = vadd.f32 %v5239_v34, %v1918_v52  ;;  %v2116_v49 = vadd.f32 %v5241_v8, %v1916_v21  ;;  %v5250_v52 = vld [vmem:[#allocation31_spill] sm:$0xff]  ;;  %v5253_v21 = vld [vmem:[#allocation33_spill] sm:$0xff] }
 0x1e5   : > { %2633 = vst.msk [vmem:[%s4841_s22 + $0x48] sm:$0xff] %vm2623_vm4, %v2600_v7  ;;  %v2605_v2 = vadd.f32 %v4829_v44, %v2566_v17  ;;  %v2564_v11 = vmul.f32 %v4819_v38, %v2525_v12  ;;  %v2528_v24 = vadd.f32 %v3386_v57, %v2321_v20  ;;  %v2319_v31 = vadd.f32 %v2230_v36, %v2109_v45  ;;  %v5243_v7 = vld [vmem:[#allocation30_spill] sm:$0xff] }
 0x1e6   : > { %v3355_v55 = vpop.f32.mrf.mxu1  ;;  %v2450_v53 = vpop.f32.mrf.mxu0  ;;  %v2119_v36 = vadd.f32 %v5244_v61, %v1919_v32 }
 0x1e7   : > { %2638 = vst.msk [vmem:[%s4841_s22 + $0x70] sm:$0xff] %vm2623_vm4, %v2605_v2  ;;  %v2603_v4 = vadd.f32 %v4829_v44, %v2564_v11  ;;  %v2567_v46 = vmul.f32 %v4819_v38, %v2528_v24  ;;  %v2526_v39 = vadd.f32 %v2437_v63, %v2319_v31  ;;  %v2324_v27 = vadd.f32 %v3355_v55, %v2114_v13  ;;  %v5242_v63 = vld [vmem:[#allocation13_spill] sm:$0xff]  ;;  %v5246_v2 = vld [vmem:[#allocation32_spill] sm:$0xff] }
 0x1e8   : > { %v2243_v60 = vpop.f32.mrf.mxu1  ;;  %v3390_v30 = vpop.f32.mrf.mxu0  ;;  %v1917_v17 = vadd.f32 %v5243_v7, %v5242_v63 }
 0x1e9   : > { %2636 = vst.msk [vmem:[%s4841_s22 + $0x60] sm:$0xff] %vm2623_vm4, %v2603_v4  ;;  %v2606_v28 = vadd.f32 %v4829_v44, %v2567_v46  ;;  %v2565_v6 = vmul.f32 %v4819_v38, %v2526_v39  ;;  %v2531_v37 = vadd.f32 %v3389_v23, %v2324_v27  ;;  %v2322_v47 = vadd.f32 %v2243_v60, %v2112_v59  ;;  %v5245_v23 = vld [vmem:[#allocation17_spill] sm:$0xff]  ;;  %v5249_v4 = vld [vmem:[#allocation34_spill] sm:$0xff] }
 0x1ea   : > { %v3356_v40 = vpop.f32.mrf.mxu1  ;;  %v2453_v62 = vpop.f32.mrf.mxu0  ;;  %v1922_v11 = vadd.f32 %v5246_v2, %v5245_v23  ;;  %v2117_v55 = vadd.f32 %v5247_v54, %v1917_v17 }
 0x1eb   : > { %2639 = vst.msk [vmem:[%s4841_s22 + $0x78] sm:$0xff] %vm2623_vm4, %v2606_v28  ;;  %v2604_v26 = vadd.f32 %v4829_v44, %v2565_v6  ;;  %v2570_v43 = vmul.f32 %v4819_v38, %v2531_v37  ;;  %v2529_v18 = vadd.f32 %v2450_v53, %v2322_v47  ;;  %v2325_v48 = vadd.f32 %v3356_v40, %v2115_v58  ;;  %v5248_v53 = vld [vmem:[#allocation19_spill] sm:$0xff]  ;;  %v5252_v28 = vld [vmem:[#allocation36_spill] sm:$0xff] }
 0x1ec   : > { %v2246_v57 = vpop.f32.mrf.mxu1  ;;  %v3393_v19 = vpop.f32.mrf.mxu0  ;;  %v1920_v46 = vadd.f32 %v5249_v4, %v5248_v53  ;;  %v2122_v60 = vadd.f32 %v5250_v52, %v1922_v11 }
 0x1ed   : > { %2637 = vst.msk [vmem:[%s4841_s22 + $0x68] sm:$0xff] %vm2623_vm4, %v2604_v26  ;;  %v2609_v9 = vadd.f32 %v4829_v44, %v2570_v43  ;;  %v2568_v0 = vmul.f32 %v4819_v38, %v2529_v18  ;;  %v2532_v14 = vadd.f32 %v3390_v30, %v2325_v48  ;;  %v2323_v45 = vadd.f32 %v2246_v57, %v2113_v50  ;;  %v5251_v30 = vld [vmem:[#allocation22_spill] sm:$0xff]  ;;  %v5256_v57 = vld [vmem:[#allocation35_spill] sm:$0xff] }
 0x1ee   : > { %v3359_v12 = vpop.f32.mrf.mxu1  ;;  %v2466_v20 = vpop.f32.mrf.mxu0  ;;  %v1923_v6 = vadd.f32 %v5252_v28, %v5251_v30  ;;  %v2120_v40 = vadd.f32 %v5253_v21, %v1920_v46  ;;  %v5255_v26 = vld [vmem:[#allocation38_spill] sm:$0xff]  ;;  %v5264_v46 = vld [vmem:[#allocation41_spill] sm:$0xff]  ;;  %v5267_v28 = vld [vmem:[#allocation43_spill] sm:$0xff] }
 0x1ef   : > { %2642 = vst.msk [vmem:[%s4841_s22 + $0x90] sm:$0xff] %vm2623_vm4, %v2609_v9  ;;  %v2607_v22 = vadd.f32 %v4829_v44, %v2568_v0  ;;  %v2571_v13 = vmul.f32 %v4819_v38, %v2532_v14  ;;  %v2530_v35 = vadd.f32 %v2453_v62, %v2323_v45  ;;  %v2328_v29 = vadd.f32 %v3359_v12, %v2118_v10  ;;  %v5254_v62 = vld [vmem:[#allocation5_spill] sm:$0xff]  ;;  %v5258_v0 = vld [vmem:[#allocation40_spill] sm:$0xff] }
 0x1f0   : > { %v2259_v24 = vpop.f32.mrf.mxu1  ;;  %v3394_v31 = vpop.f32.mrf.mxu0  ;;  %v1921_v43 = vadd.f32 %v5255_v26, %v5254_v62  ;;  %v5257_v9 = vld [vmem:[#allocation21_spill] sm:$0xff] }
 0x1f1   : > { %2640 = vst.msk [vmem:[%s4841_s22 + $0x80] sm:$0xff] %vm2623_vm4, %v2607_v22  ;;  %v2610_v1 = vadd.f32 %v4829_v44, %v2571_v13  ;;  %v2569_v59 = vmul.f32 %v4819_v38, %v2530_v35  ;;  %v2535_v42 = vadd.f32 %v3393_v19, %v2328_v29  ;;  %v2326_v16 = vadd.f32 %v2259_v24, %v2116_v49  ;;  %v5259_v12 = vld [vmem:[#allocation37_spill] sm:$0xff]  ;;  %v5260_v22 = vld [vmem:[#allocation6_spill] sm:$0xff]  ;;  %v5262_v24 = vld [vmem:[#allocation39_spill] sm:$0xff] }
 0x1f2   : > { %v3360_v39 = vpop.f32.mrf.mxu1  ;;  %v2469_v27 = vpop.f32.mrf.mxu0  ;;  %v2123_v19 = vadd.f32 %v5256_v57, %v1923_v6  ;;  %v1926_v14 = vadd.f32 %v5258_v0, %v5257_v9  ;;  %v5261_v13 = vld [vmem:[#allocation42_spill] sm:$0xff] }
 0x1f3   : > { %2643 = vst.msk [vmem:[%s4841_s22 + $0x98] sm:$0xff] %vm2623_vm4, %v2610_v1  ;;  %v2608_v15 = vadd.f32 %v4829_v44, %v2569_v59  ;;  %v2574_v58 = vmul.f32 %v4819_v38, %v2535_v42  ;;  %v2533_v25 = vadd.f32 %v2466_v20, %v2326_v16  ;;  %v2329_v41 = vadd.f32 %v3360_v39, %v2119_v36  ;;  %v5263_v1 = vld [vmem:[#allocation8_spill] sm:$0xff] }
 0x1f4   : > { %v2262_v37 = vpop.f32.mrf.mxu1  ;;  %v3397_v47 = vpop.f32.mrf.mxu0  ;;  %v2121_v20 = vadd.f32 %v5259_v12, %v1921_v43  ;;  %v1924_v35 = vadd.f32 %v5261_v13, %v5260_v22  ;;  %v1927_v59 = vadd.f32 %v4800_v56, %v5263_v1 }
 0x1f5   : > { %2641 = vst.msk [vmem:[%s4841_s22 + $0x88] sm:$0xff] %vm2623_vm4, %v2608_v15  ;;  %v2613_v51 = vadd.f32 %v4829_v44, %v2574_v58  ;;  %v2572_v50 = vmul.f32 %v4819_v38, %v2533_v25  ;;  %v2536_v5 = vadd.f32 %v3394_v31, %v2329_v41  ;;  %v2327_v3 = vadd.f32 %v2262_v37, %v2117_v55  ;;  %v5266_v15 = vld [vmem:[#allocation45_spill] sm:$0xff] }
 0x1f6   : > { %v3363_v18 = vpop.f32.mrf.mxu1  ;;  %v2482_v48 = vpop.f32.mrf.mxu0  ;;  %v2126_v31 = vadd.f32 %v5262_v24, %v1926_v14  ;;  %v2124_v39 = vadd.f32 %v5264_v46, %v1924_v35  ;;  %v2127_v6 = vadd.f32 %v5267_v28, %v1927_v59 }
 0x1f7   : > { %2646 = vst.msk [vmem:[%s4841_s22 + $0xb0] sm:$0xff] %vm2623_vm4, %v2613_v51  ;;  %v2611_v34 = vadd.f32 %v4829_v44, %v2572_v50  ;;  %v2575_v10 = vmul.f32 %v4819_v38, %v2536_v5  ;;  %v2534_v33 = vadd.f32 %v2469_v27, %v2327_v3  ;;  %v2332_v32 = vadd.f32 %v3363_v18, %v2122_v60  ;;  %v5265_v27 = vld [vmem:[#allocation11_spill] sm:$0xff]  ;;  %v5268_v3 = vld [vmem:[#allocation44_spill] sm:$0xff] }
 0x1f8   : > { %v2275_v45 = vpop.f32.mrf.mxu1  ;;  %v3398_v8 = vpop.f32.mrf.mxu0  ;;  %v1925_v58 = vadd.f32 %v5266_v15, %v5265_v27 }
 0x1f9   : > { %2644 = vst.msk [vmem:[%s4841_s22 + $0xa0] sm:$0xff] %vm2623_vm4, %v2611_v34  ;;  %v2614_v49 = vadd.f32 %v4829_v44, %v2575_v10  ;;  %v2573_v63 = vmul.f32 %v4819_v38, %v2534_v33  ;;  %v2539_v7 = vadd.f32 %v3397_v47, %v2332_v32  ;;  %v2330_v17 = vadd.f32 %v2275_v45, %v2120_v40 }
 0x1fa   : > { %v3364_v29 = vpop.f32.mrf.mxu1  ;;  %v2485_v61 = vpop.f32.mrf.mxu0  ;;  %v2125_v21 = vadd.f32 %v5268_v3, %v1925_v58 }
 0x1fb   : > { %2647 = vst.msk [vmem:[%s4841_s22 + $0xb8] sm:$0xff] %vm2623_vm4, %v2614_v49  ;;  %v2612_v36 = vadd.f32 %v4829_v44, %v2573_v63  ;;  %v2578_v23 = vmul.f32 %v4819_v38, %v2539_v7  ;;  %v2537_v2 = vadd.f32 %v2482_v48, %v2330_v17  ;;  %v2333_v11 = vadd.f32 %v3364_v29, %v2123_v19 }
 0x1fc   : > { %v2278_v42 = vpop.f32.mrf.mxu1  ;;  %v3401_v16 = vpop.f32.mrf.mxu0 }
 0x1fd   : > { %2645 = vst.msk [vmem:[%s4841_s22 + $0xa8] sm:$0xff] %vm2623_vm4, %v2612_v36  ;;  %v2617_v54 = vadd.f32 %v4829_v44, %v2578_v23  ;;  %v2576_v55 = vmul.f32 %v4819_v38, %v2537_v2  ;;  %v2540_v53 = vadd.f32 %v3398_v8, %v2333_v11  ;;  %v2331_v4 = vadd.f32 %v2278_v42, %v2121_v20 }
 0x1fe   : > { %v3367_v25 = vpop.f32.mrf.mxu1  ;;  %v2498_v41 = vpop.f32.mrf.mxu0 }
 0x1ff   : > { %2650 = vst.msk [vmem:[%s4841_s22 + $0xd0] sm:$0xff] %vm2623_vm4, %v2617_v54  ;;  %v2615_v56 = vadd.f32 %v4829_v44, %v2576_v55  ;;  %v2579_v52 = vmul.f32 %v4819_v38, %v2540_v53  ;;  %v2538_v60 = vadd.f32 %v2485_v61, %v2331_v4  ;;  %v2336_v30 = vadd.f32 %v3367_v25, %v2126_v31 }
 0x200   : > { %v2291_v37 = vpop.f32.mrf.mxu1  ;;  %v3402_v62 = vpop.f32.mrf.mxu0 }
 0x201   : > { %2648 = vst.msk [vmem:[%s4841_s22 + $0xc0] sm:$0xff] %vm2623_vm4, %v2615_v56  ;;  %v2618_v47 = vadd.f32 %v4829_v44, %v2579_v52  ;;  %v2577_v51 = vmul.f32 %v4819_v38, %v2538_v60  ;;  %v2543_v50 = vadd.f32 %v3401_v16, %v2336_v30  ;;  %v2334_v5 = vadd.f32 %v2291_v37, %v2124_v39 }
 0x202   : > { %v3368_v40 = vpop.f32.mrf.mxu1  ;;  %v2501_v19 = vpop.f32.mrf.mxu0 }
 0x203   : > { %2651 = vst.msk [vmem:[%s4841_s22 + $0xd8] sm:$0xff] %vm2623_vm4, %v2618_v47  ;;  %v2616_v26 = vadd.f32 %v4829_v44, %v2577_v51  ;;  %v2582_v43 = vmul.f32 %v4819_v38, %v2543_v50  ;;  %v2541_v18 = vadd.f32 %v2498_v41, %v2334_v5  ;;  %v2337_v48 = vadd.f32 %v3368_v40, %v2127_v6 }
 0x204   : > { %v2294_v34 = vpop.f32.mrf.mxu1 }
 0x205   : > { %2649 = vst.msk [vmem:[%s4841_s22 + $0xc8] sm:$0xff] %vm2623_vm4, %v2616_v26  ;;  %v2621_v10 = vadd.f32 %v4829_v44, %v2582_v43  ;;  %v2580_v33 = vmul.f32 %v4819_v38, %v2541_v18  ;;  %v2544_v32 = vadd.f32 %v3402_v62, %v2337_v48  ;;  %v2335_v57 = vadd.f32 %v2294_v34, %v2125_v21 }
 0x207   : > { %2654 = vst.msk [vmem:[%s4841_s22 + $0xf0] sm:$0xff] %vm2623_vm4, %v2621_v10  ;;  %v2619_v9 = vadd.f32 %v4829_v44, %v2580_v33  ;;  %v2583_v0 = vmul.f32 %v4819_v38, %v2544_v32  ;;  %v2542_v14 = vadd.f32 %v2501_v19, %v2335_v57 }
 0x209   : > { %2652 = vst.msk [vmem:[%s4841_s22 + $0xe0] sm:$0xff] %vm2623_vm4, %v2619_v9  ;;  %v2622_v45 = vadd.f32 %v4829_v44, %v2583_v0  ;;  %v2581_v8 = vmul.f32 %v4819_v38, %v2542_v14 }
 0x20b   : > { %2655 = vst.msk [vmem:[%s4841_s22 + $0xf8] sm:$0xff] %vm2623_vm4, %v2622_v45  ;;  %v2620_v49 = vadd.f32 %v4829_v44, %v2581_v8 }
 0x20d   : > { %2653 = vst.msk [vmem:[%s4841_s22 + $0xe8] sm:$0xff] %vm2623_vm4, %v2620_v49 }
 0x20e   : > { %3486 = shalt.err (!%p3483_p5)
}
 0x20f   : > { %s3487_s10 = scalar_lea.hbm %s5042_s5, 4096  ;;  %s3491_s13 = scalar_lea.hbm %s5102_s4, 8192 }
 0x210   : > { %p3488_p6 = scmp.ne.s32.totalorder %s5042_s5, %s3487_s10  ;;  %p3492_p10 = scmp.lt.s32.totalorder %s5042_s5, %s5102_s4 }
 0x211   : > { %p3493_p11 = scmp.lt.s32.totalorder %s3491_s13, %s3487_s10 }
 0x212   : > { %p3489_p7 = pnand %p3488_p6, %p3619_p4 }
 0x213   : > { %p3494_p12 = por %p3493_p11, %p3492_p10 }
 0x214   : > { %p3490_p9 = pneg %p3489_p7 }
 0x216   : > { %p3495_p13 = pnand %p3494_p12, %p3490_p9 }
 0x218   : > { %3498 = shalt.err (!%p3495_p13)
}
 0x219   : > { %s3552_s22 = smov 128   ;;  %s3553_s24 = smov 8  }
 0x21a   : > { %3416 = dma.vmem_to_hbm [thread:$0]  (%p3619_p4), %s5044_s26, 4096, %s5042_s5, %s5053_s18, %s3552_s22, %s3552_s22, %s3553_s24  }
 0x21b PF: > { %p3422_p0 = scmp.ge.s32.totalorder %s3549_s20, 2  ;;  %s2686_s29 = sand.u32 1, %s3529_s15  }
 0x21c   : > { %s2687_s30 = scalar_lea.sflag [#allocation3], %s2686_s29 }
 0x21d   : > { %p3419_p1 = pnand %p3422_p0, %p3626_p8 }
 0x21f   : > { %p3420_p2 = pneg %p3419_p1 }
 0x221   : > { %3524 = dma.done.wait (%p3420_p2), %s2687_s30, 4096  }
 0x222   : > { %3526 = vsyncadd (%p3420_p2), %s2687_s30, 4294963200  ;;  %s17_s20 = sadd.s32 1, %s3549_s20   ;;  %s5269_s15 = smov %s3533_s16 }
 0x223   : > { %p14_p3 = scmp.ge.s32.totalorder %s17_s20, 4   ;;  %s5270_s16 = smov %s3537_s17 }
 0x224   : > { %s5271_s17 = smov %s3632_s28  ;;  %s5272_s18 = smov %s3545_s19 }
 0x225   : > { %s5273_s19 = smov %s5275_s23  ;;  %16 = sbr.rel (!%p14_p3) target bundleno = 4 (0x4), region = 80 }
 0x22a   :  { %2692 = vsyncpa [#allocation3], 1 }
 0x22b   :  { %2694 = vsyncpa [#allocation3 + $0x1], 1 }

</bundles_post_ra>
